<compile_context>
chip_gen: v7x
topology: tpu7x:2x2x1
jax: 0.10.0
libtpu: 0.0.40
codegen_flags: <defaults>
</compile_context>

<pallas_src>
import itertools

import numpy as np
import jax
import jax.numpy as jnp
from jax.experimental import pallas as pl
from jax.experimental.pallas import tpu as pltpu


MAX_MATCHES = 128   # static pad (lanes) for matched boxes; bumped only if exceeded


# ============================================================================
# Generation-aware VMEM budgeting
# ============================================================================

def _vmem_budget():
    """Returns (logits_block_budget_bytes, vmem_limit_bytes)."""
    try:
        cap = int(pltpu.get_tpu_info().vmem_capacity_bytes)
    except Exception:
        cap = 64 * 1024 * 1024            # conservative: v7x physical VMEM
    if cap >= 128 * 1024 * 1024:          # v5e / v6e: large VMEM, bigger tiles
        return 24 * 1024 * 1024, 64 * 1024 * 1024
    return 12 * 1024 * 1024, 32 * 1024 * 1024


def _pick_q_tile(q, n_layers, b, c, itemsize, budget_bytes):
    """Largest query tile (multiple of 8, divides Q) whose L double-buffered
    logits blocks fit the budget; falls back to the full query dim (legal)."""
    def cost(tq):
        return 2 * n_layers * b * tq * c * itemsize
    for tq in (2048, 1024, 512, 256, 128, 64, 32, 16, 8):
        if q % tq == 0 and cost(tq) <= budget_bytes:
            return tq
    return q


# ============================================================================
# Pallas kernels
# ============================================================================

def _make_fused_kernel(num_layers, num_q_tiles, alpha, gamma):
    """Fused sigmoid-focal-loss sum + per-image cardinality counts.

    Grid: (QT,).  Per step, each layer's [B, TQ, C] logits block is read from
    HBM exactly once and feeds both losses.  Partial sums go to per-tile SMEM
    output slots (no serializing accumulator chain)."""

    def kernel(*refs):
        logits_refs = refs[:num_layers]          # L x VMEM [B, TQ, C]
        tgt_cls_ref = refs[num_layers]           # VMEM [L, B, TQ, 1] i32
        focal_ref = refs[num_layers + 1]         # SMEM [L, QT] f32
        card_ref = refs[num_layers + 2]          # SMEM [L, B*QT] f32
        qt = pl.program_id(0)

        for l in range(num_layers):
            x = logits_refs[l][...].astype(jnp.float32)      # [B, TQ, C]
            tc = tgt_cls_ref[l]                              # [B, TQ, 1] i32
            nb, ntq, nc = x.shape
            cls_iota = jax.lax.broadcasted_iota(jnp.int32, (nb, ntq, nc), 2)
            # one-hot over C+1 classes with last column dropped (torch ref)
            is_pos = cls_iota == tc                          # [B, TQ, C]

            # ---- sigmoid focal loss: one exp + log1p + approx reciprocal ----
            e = jnp.exp(-jnp.abs(x))                         # exp(-|x|)
            ce = jnp.maximum(x, 0.0) - jnp.where(is_pos, x, 0.0) + jnp.log1p(e)
            r = pl.reciprocal(1.0 + e, approx=True)          # sigmoid(|x|)
            prob = jnp.where(x >= 0, r, 1.0 - r)             # sigmoid(x)
            p_t = jnp.where(is_pos, prob, 1.0 - prob)
            one_m = 1.0 - p_t
            mod = one_m * one_m if gamma == 2.0 else one_m ** gamma
            loss = ce * mod
            if alpha >= 0:
                loss = loss * jnp.where(is_pos, alpha, 1.0 - alpha)
            focal_ref[l, qt] = jnp.sum(loss)

            # ---- cardinality: argmax(x,-1) != C-1
            #      <=>  max_{c != C-1} x_c >= x_{C-1}
            # (class C-1 as "no object" mirrors the PyTorch reference quirk)
            neg = jnp.float32(-3.0e38)
            last_val = x[:, :, nc - 1:nc]                    # static column slice
            other_max = jnp.max(jnp.where(cls_iota == (nc - 1), neg, x),
                                axis=2, keepdims=True)
            nonempty = (other_max >= last_val).astype(jnp.float32)  # [B,TQ,1]
            for b in range(nb):
                card_ref[l, b * num_q_tiles + qt] = jnp.sum(nonempty[b])

    return kernel


def _box_loss_kernel(n_valid_ref, boxes_ref, out_ref):
    """Matched-box losses for all layers in a single grid step.

    boxes_ref : VMEM [L, 8, N] f32, rows 0-3 = matched src (cx,cy,w,h),
                rows 4-7 = matched tgt (full sublane use, one DMA per layer).
    n_valid_ref : SMEM [1] i32 runtime count of valid columns (no recompile).
    out_ref   : SMEM [L, 4] f32 = [sum_l1, sum(1-giou), sum_xy, sum_hw].
    Padded columns (>= n_valid) are masked to contribute exactly 0; they hold
    finite dummy boxes with positive area so the GIoU denominators (no eps,
    matching the torch reference exactly) never vanish.
    """
    num_layers, _, n = boxes_ref.shape
    lane = jax.lax.broadcasted_iota(jnp.int32, (1, n), 1)
    valid = (lane < n_valid_ref[0]).astype(jnp.float32)          # [1, N]

    for l in range(num_layers):
        bx = boxes_ref[l]                                        # [8, N]
        s = bx[0:4, :]
        t = bx[4:8, :]

        l1 = jnp.abs(s - t)
        loss_xy = jnp.sum(l1[0:2, :] * valid)
        loss_hw = jnp.sum(l1[2:4, :] * valid)

        scx, scy, sw, sh = s[0:1, :], s[1:2, :], s[2:3, :], s[3:4, :]
        tcx, tcy, tw, th = t[0:1, :], t[1:2, :], t[2:3, :], t[3:4, :]
        sx1, sy1 = scx - 0.5 * sw, scy - 0.5 * sh
        sx2, sy2 = scx + 0.5 * sw, scy + 0.5 * sh
        tx1, ty1 = tcx - 0.5 * tw, tcy - 0.5 * th
        tx2, ty2 = tcx + 0.5 * tw, tcy + 0.5 * th

        area_s = (sx2 - sx1) * (sy2 - sy1)
        area_t = (tx2 - tx1) * (ty2 - ty1)
        iw = jnp.maximum(jnp.minimum(sx2, tx2) - jnp.maximum(sx1, tx1), 0.0)
        ih = jnp.maximum(jnp.minimum(sy2, ty2) - jnp.maximum(sy1, ty1), 0.0)
        inter = iw * ih
        union = area_s + area_t - inter
        iou = inter / union
        cw = jnp.maximum(sx2, tx2) - jnp.minimum(sx1, tx1)
        ch = jnp.maximum(sy2, ty2) - jnp.minimum(sy1, ty1)
        area_c = cw * ch
        giou = iou - (area_c - union) / area_c
        loss_giou = jnp.sum((1.0 - giou) * valid)

        out_ref[l, 0] = loss_xy + loss_hw
        out_ref[l, 1] = loss_giou
        out_ref[l, 2] = loss_xy
        out_ref[l, 3] = loss_hw


# ============================================================================
# Pallas wrappers
# ============================================================================

def fused_focal_cardinality(logits_list, tgt_cls, alpha, gamma):
    """logits_list: L arrays [B, Q, C] (native dtype, each read from HBM once).
    tgt_cls [L, B, Q, 1] i32 (value == num_classes -> "no object").
    Returns (focal_sum [L] f32, per-image non-empty counts [L, B] f32)."""
    num_layers = len(logits_list)
    B, Q, C = logits_list[0].shape
    block_budget, vmem_limit = _vmem_budget()
    tq = _pick_q_tile(Q, num_layers, B, C,
                      logits_list[0].dtype.itemsize, block_budget)
    nqt = Q // tq

    kernel = _make_fused_kernel(num_layers, nqt, alpha, gamma)
    in_specs = [pl.BlockSpec((B, tq, C), lambda q: (0, q, 0))
                for _ in range(num_layers)]
    in_specs.append(pl.BlockSpec((num_layers, B, tq, 1),
                                 lambda q: (0, 0, q, 0)))
    smem = pl.BlockSpec(memory_space=pltpu.MemorySpace.SMEM)

    focal, card = pl.pallas_call(
        kernel,
        grid=(nqt,),
        in_specs=in_specs,
        out_specs=(smem, smem),
        out_shape=(jax.ShapeDtypeStruct((num_layers, nqt), jnp.float32),
                   jax.ShapeDtypeStruct((num_layers, B * nqt), jnp.float32)),
        compiler_params=pltpu.CompilerParams(
            dimension_semantics=("arbitrary",),
            vmem_limit_bytes=vmem_limit),
    )(*logits_list, tgt_cls.astype(jnp.int32))

    focal_sum = jnp.sum(focal, axis=1)                               # [L]
    counts = jnp.sum(card.reshape(num_layers, B, nqt), axis=2)       # [L, B]
    return focal_sum, counts


def box_loss_sums(boxes_slab, n_valid):
    """boxes_slab [L, 8, N] f32 (rows 0-3 src, 4-7 tgt), n_valid i32 [1]
    -> [L, 4] f32 loss sums.  One grid step for all layers."""
    L, _, N = boxes_slab.shape
    grid_spec = pltpu.PrefetchScalarGridSpec(
        num_scalar_prefetch=1,
        grid=(1,),
        in_specs=[pl.BlockSpec((L, 8, N), lambda i, nv: (0, 0, 0))],
        out_specs=pl.BlockSpec(memory_space=pltpu.MemorySpace.SMEM),
    )
    return pl.pallas_call(
        _box_loss_kernel,
        out_shape=jax.ShapeDtypeStruct((L, 4), jnp.float32),
        grid_spec=grid_spec,
        compiler_params=pltpu.CompilerParams(
            dimension_semantics=("arbitrary",),
            vmem_limit_bytes=16 * 1024 * 1024),
    )(n_valid.astype(jnp.int32), boxes_slab.astype(jnp.float32))


# ============================================================================
# Host-side glue: matcher, gathers
# ============================================================================

def _cxcywh_to_xyxy_np(b):
    cx, cy, w, h = b[:, 0], b[:, 1], b[:, 2], b[:, 3]
    return np.stack([cx - 0.5 * w, cy - 0.5 * h, cx + 0.5 * w, cy + 0.5 * h], -1)


def _giou_np(a, b):
    area_a = (a[:, 2] - a[:, 0]) * (a[:, 3] - a[:, 1])
    area_b = (b[:, 2] - b[:, 0]) * (b[:, 3] - b[:, 1])
    lt = np.maximum(a[:, None, :2], b[None, :, :2])
    rb = np.minimum(a[:, None, 2:], b[None, :, 2:])
    wh = np.clip(rb - lt, 0, None)
    inter = wh[..., 0] * wh[..., 1]
    union = area_a[:, None] + area_b[None, :] - inter
    iou = inter / union
    lt_c = np.minimum(a[:, None, :2], b[None, :, :2])
    rb_c = np.maximum(a[:, None, 2:], b[None, :, 2:])
    wh_c = np.clip(rb_c - lt_c, 0, None)
    area_c = wh_c[..., 0] * wh_c[..., 1]
    return iou - (area_c - union) / area_c


def hungarian_matcher(outputs, targets, *, cost_class=2.0, cost_bbox=5.0,
                      cost_giou=2.0, alpha=0.25, gamma=2.0):
    """Exact brute-force assignment on host (targets are tiny in this demo).
    TODO(synk): on-device cost matrix + assignment for production-size Q
    (the host round-trip dominates wall-clock for Q=300..900)."""
    logits = np.asarray(outputs['pred_logits'], np.float32)
    boxes = np.asarray(outputs['pred_boxes'], np.float32)
    B, Q, _ = logits.shape
    indices = []
    for b in range(B):
        tgt_ids = np.asarray(targets[b]['labels'], np.int64)
        tgt_bbox = np.asarray(targets[b]['boxes'], np.float32)
        n = len(tgt_ids)
        if n == 0:
            indices.append((np.zeros((0,), np.int64), np.zeros((0,), np.int64)))
            continue
        prob = 1.0 / (1.0 + np.exp(-logits[b]))
        neg = (1 - alpha) * (prob ** gamma) * (-np.log(1 - prob + 1e-8))
        pos = alpha * ((1 - prob) ** gamma) * (-np.log(prob + 1e-8))
        c_cls = pos[:, tgt_ids] - neg[:, tgt_ids]
        c_box = np.abs(boxes[b][:, None, :] - tgt_bbox[None, :, :]).sum(-1)
        c_giou = -_giou_np(_cxcywh_to_xyxy_np(boxes[b]),
                           _cxcywh_to_xyxy_np(tgt_bbox))
        C = cost_bbox * c_box + cost_class * c_cls + cost_giou * c_giou
        best, best_cost = None, np.inf
        for perm in itertools.permutations(range(Q), n):
            c = sum(C[perm[j], j] for j in range(n))
            if c < best_cost:
                best_cost, best = c, perm
        indices.append((np.asarray(best, np.int64), np.arange(n, dtype=np.int64)))
    return indices


def _class_error(logits, targets, indices):
    bidx, sidx, labels = [], [], []
    for b, (src, tgt) in enumerate(indices):
        if len(src) > 0:
            bidx.append(np.full(len(src), b, np.int64))
            sidx.append(np.asarray(src, np.int64))
            labels.append(np.asarray(targets[b]['labels'],
                                     np.int64)[np.asarray(tgt, np.int64)])
    if not bidx:
        return jnp.float32(100.0)
    bidx = np.concatenate(bidx)
    sidx = np.concatenate(sidx)
    labels = jnp.asarray(np.concatenate(labels))
    matched = jnp.asarray(logits)[bidx, sidx]                  # device gather
    acc = 100.0 * jnp.mean(
        (jnp.argmax(matched, axis=-1) == labels).astype(jnp.float32))
    return 100.0 - acc


def _matched_box_slab(pred_boxes, targets, indices, n_pad):
    """Gather matched (src, tgt) boxes for one layer; return [8, n_pad] slab
    (rows 0-3 src cxcywh, rows 4-7 tgt cxcywh).  Padding uses finite boxes."""
    bidx, sidx, tb = [], [], []
    for b, (src, tgt) in enumerate(indices):
        if len(src) > 0:
            bidx.append(np.full(len(src), b, np.int64))
            sidx.append(np.asarray(src, np.int64))
            tb.append(np.asarray(targets[b]['boxes'],
                                 np.float32)[np.asarray(tgt, np.int64)])
    if bidx:
        bidx = np.concatenate(bidx)
        sidx = np.concatenate(sidx)
        tgt_np = np.concatenate(tb, 0)
        n = bidx.shape[0]
        src = jnp.asarray(pred_boxes)[bidx, sidx].astype(jnp.float32)  # [n,4]
    else:
        n = 0
        src = jnp.zeros((0, 4), jnp.float32)
        tgt_np = np.zeros((0, 4), np.float32)
    pad = jnp.full((n_pad - n, 4), 0.5, jnp.float32)   # finite dummy boxes
    src_p = jnp.concatenate([src, pad], axis=0).T                   # [4, n_pad]
    tgt_p = jnp.concatenate([jnp.asarray(tgt_np), pad], axis=0).T   # [4, n_pad]
    return jnp.concatenate([src_p, tgt_p], axis=0)                  # [8, n_pad]


# ============================================================================
# SetCriterion (forward only; eval mode -> dn losses are zeros)
# ============================================================================

_DN_KEYS = ('loss_bbox_dn', 'loss_giou_dn', 'loss_ce_dn',
            'loss_xy_dn', 'loss_hw_dn', 'cardinality_error_dn')


class SetCriterion:
    def __init__(self, num_classes, matcher, weight_dict, focal_alpha, losses):
        self.num_classes = num_classes
        self.matcher = matcher
        self.weight_dict = weight_dict
        self.focal_alpha = focal_alpha
        self.losses = losses
        self.training = False

    def forward(self, outputs, targets):
        outputs_without_aux = {k: v for k, v in outputs.items()
                               if k != 'aux_outputs'}

        # Every decoder "layer" (main / aux / interm) gets the same losses.
        layers = [('', outputs_without_aux, True)]
        if 'aux_outputs' in outputs:
            for i, aux in enumerate(outputs['aux_outputs']):
                layers.append((f'_{i}', aux, False))
        if 'interm_outputs' in outputs:
            layers.append(('_interm', outputs['interm_outputs'], False))
        # TODO(synk): 'enc_outputs', 'masks' loss and the training-time
        # denoising (dn) branch are not ported.

        indices_per_layer = [self.matcher(lo, targets) for _, lo, _ in layers]

        num_boxes = float(sum(len(t['labels']) for t in targets))
        num_boxes = max(num_boxes, 1.0)

        L = len(layers)
        B, Q, _C = np.shape(outputs['pred_logits'])

        losses = {}

        # eval-mode dn losses are zeros (mirrors the reference)
        dn_meta = outputs.get('dn_meta', None)
        if not (self.training and dn_meta
                and 'output_known_lbs_bboxes' in dn_meta):
            for k in _DN_KEYS:
                losses[k] = jnp.float32(0.0)
        if 'aux_outputs' in outputs:
            for i in range(len(outputs['aux_outputs'])):
                for k in _DN_KEYS:
                    losses[k + f'_{i}'] = jnp.float32(0.0)

        # -------- ONE fused Pallas launch: focal + cardinality, all layers --
        # (no jnp.stack of the logits: L separate inputs, each read once)
        need_logits = ('labels' in self.losses) or ('cardinality' in self.losses)
        if need_logits:
            logits_list = [jnp.asarray(lo['pred_logits']) for _, lo, _ in layers]
            tgt_cls = np.full((L, B, Q, 1), self.num_classes, np.int32)
            for li, indices in enumerate(indices_per_layer):
                for b, (src, tgt) in enumerate(indices):
                    if len(src) > 0:
                        lab = np.asarray(targets[b]['labels'], np.int64)
                        tgt_cls[li, b, np.asarray(src, np.int64), 0] = \
                            lab[np.asarray(tgt, np.int64)]
            focal_sum, counts = fused_focal_cardinality(
                logits_list, jnp.asarray(tgt_cls), self.focal_alpha, 2.0)
            tgt_len = jnp.asarray([len(t['labels']) for t in targets],
                                  jnp.float32)
            card_err = jnp.mean(jnp.abs(counts - tgt_len[None, :]), axis=1)

        # -------- ONE Pallas launch (one grid step) for all layers' boxes ----
        if 'boxes' in self.losses:
            n_total = int(sum(len(t['labels']) for t in targets))
            # fixed static pad -> no per-batch recompiles; bumped only if the
            # (rare) case of more matches than MAX_MATCHES occurs.
            n_pad = MAX_MATCHES if n_total <= MAX_MATCHES \
                else ((n_total + 127) // 128) * 128
            slabs = [_matched_box_slab(lo['pred_boxes'], targets,
                                       indices_per_layer[li], n_pad)
                     for li, (_, lo, _) in enumerate(layers)]
            box_sums = box_loss_sums(jnp.stack(slabs, 0),
                                     jnp.asarray([n_total], jnp.int32))  # [L,4]

        # -------- scatter per-layer scalars into the loss dict ---------------
        for li, (suffix, lo, log) in enumerate(layers):
            if 'labels' in self.losses:
                # sigmoid_focal_loss(...).mean(1).sum()/num_boxes * Q
                #   == focal_sum / num_boxes
                losses['loss_ce' + suffix] = focal_sum[li] / num_boxes
                if log:
                    losses['class_error'] = _class_error(
                        lo['pred_logits'], targets, indices_per_layer[li])
            if 'cardinality' in self.losses:
                losses['cardinality_error' + suffix] = card_err[li]
            if 'boxes' in self.losses:
                losses['loss_bbox' + suffix] = box_sums[li, 0] / num_boxes
                losses['loss_giou' + suffix] = box_sums[li, 1] / num_boxes
                losses['loss_xy' + suffix] = box_sums[li, 2] / num_boxes
                losses['loss_hw' + suffix] = box_sums[li, 3] / num_boxes
        return losses


# ============================================================================
# Example run
# ============================================================================

if __name__ == "__main__":
    key = jax.random.PRNGKey(0)
    keys = jax.random.split(key, 8)

    B, Q, C = 2, 16, 32  # batch, queries, num_classes

    def make_layer(k1, k2):
        return {'pred_logits': jax.random.normal(k1, (B, Q, C), jnp.float32),
                'pred_boxes': jax.nn.sigmoid(
                    jax.random.normal(k2, (B, Q, 4), jnp.float32))}

    main = make_layer(keys[0], keys[1])
    aux_outputs = [make_layer(keys[2], keys[3]), make_layer(keys[4], keys[5])]
    interm_outputs = make_layer(keys[6], keys[7])

    targets = [
        {'labels': np.array([3, 7], np.int64),
         'boxes': np.array([[0.30, 0.40, 0.20, 0.10],
                            [0.60, 0.50, 0.30, 0.20]], np.float32)},
        {'labels': np.array([1], np.int64),
         'boxes': np.array([[0.50, 0.50, 0.40, 0.30]], np.float32)},
    ]

    outputs = {'pred_logits': main['pred_logits'],
               'pred_boxes': main['pred_boxes'],
               'aux_outputs': aux_outputs,
               'interm_outputs': interm_outputs,
               'dn_meta': None}

    weight_dict = {'loss_ce': 1.0, 'loss_bbox': 5.0, 'loss_giou': 2.0}
    criterion = SetCriterion(num_classes=C,
                             matcher=hungarian_matcher,
                             weight_dict=weight_dict,
                             focal_alpha=0.25,
                             losses=['labels', 'boxes', 'cardinality'])

    losses = criterion.forward(outputs, targets)
    jax.block_until_ready(jax.tree_util.tree_leaves(losses))
    print("KERNEL_OK")
</pallas_src>

<mosaic_0001>
module attributes {stable_mosaic.version = 11 : i64} {
  func.func @kernel(%arg0: i32, %arg1: memref<2x16x32xf32, #tpu.memory_space<vmem>>, %arg2: memref<2x16x32xf32, #tpu.memory_space<vmem>>, %arg3: memref<2x16x32xf32, #tpu.memory_space<vmem>>, %arg4: memref<2x16x32xf32, #tpu.memory_space<vmem>>, %arg5: memref<4x2x16x1xi32, #tpu.memory_space<vmem>>, %arg6: memref<4x1xf32, #tpu.memory_space<smem>>, %arg7: memref<4x2xf32, #tpu.memory_space<smem>>) attributes {dimension_semantics = [#tpu.dimension_semantics<arbitrary>], iteration_bounds = array<i64: 1>, scalar_prefetch = 0 : i64, scratch_operands = 0 : i64, tpu.core_type = #tpu.core_type<tc>, window_params = [{transform_indices = @transform_0, window_bounds = array<i64: 2, 16, 32>}, {transform_indices = @transform_1, window_bounds = array<i64: 2, 16, 32>}, {transform_indices = @transform_2, window_bounds = array<i64: 2, 16, 32>}, {transform_indices = @transform_3, window_bounds = array<i64: 2, 16, 32>}, {transform_indices = @transform_4, window_bounds = array<i64: 4, 2, 16, 1>}, {transform_indices = @transform_5, window_bounds = array<i64: 4, 1>}, {transform_indices = @transform_6, window_bounds = array<i64: 4, 2>}]} {
    %c0 = arith.constant 0 : index
    %c0_0 = arith.constant 0 : index
    %c0_1 = arith.constant 0 : index
    %0 = vector.load %arg1[%c0, %c0_0, %c0_1] : memref<2x16x32xf32, #tpu.memory_space<vmem>>, vector<2x16x32xf32>
    %c0_2 = arith.constant 0 : index
    %c0_3 = arith.constant 0 : index
    %c0_4 = arith.constant 0 : index
    %c0_5 = arith.constant 0 : index
    %1 = vector.load %arg5[%c0_2, %c0_3, %c0_4, %c0_5] : memref<4x2x16x1xi32, #tpu.memory_space<vmem>>, vector<1x2x16x1xi32>
    %2 = vector.shape_cast %1 : vector<1x2x16x1xi32> to vector<2x16x1xi32>
    %3 = tpu.iota {dimensions = array<i32: 2>} : vector<2x16x32xi32>
    %4 = vector.broadcast %2 : vector<2x16x1xi32> to vector<2x16x32xi32>
    %5 = arith.cmpi eq, %3, %4 : vector<2x16x32xi32>
    %6 = math.absf %0 : vector<2x16x32xf32>
    %cst = arith.constant 0.000000e+00 : f32
    %7 = vector.broadcast %cst : f32 to vector<2x16x32xf32>
    %8 = arith.subf %7, %6 : vector<2x16x32xf32>
    %9 = math.exp %8 : vector<2x16x32xf32>
    %cst_6 = arith.constant 0.000000e+00 : f32
    %10 = vector.broadcast %cst_6 : f32 to vector<2x16x32xf32>
    %11 = arith.maximumf %0, %10 : vector<2x16x32xf32>
    %cst_7 = arith.constant 0.000000e+00 : f32
    %12 = vector.broadcast %cst_7 : f32 to vector<2x16x32xf32>
    %13 = arith.select %5, %0, %12 : vector<2x16x32xi1>, vector<2x16x32xf32>
    %14 = arith.subf %11, %13 : vector<2x16x32xf32>
    %15 = math.log1p %9 : vector<2x16x32xf32>
    %16 = arith.addf %14, %15 : vector<2x16x32xf32>
    %cst_8 = arith.constant 1.000000e+00 : f32
    %17 = vector.broadcast %cst_8 : f32 to vector<2x16x32xf32>
    %18 = arith.addf %17, %9 : vector<2x16x32xf32>
    %19 = tpu.reciprocal %18 {approx = true} : vector<2x16x32xf32> -> vector<2x16x32xf32>
    %cst_9 = arith.constant 0.000000e+00 : f32
    %20 = vector.broadcast %cst_9 : f32 to vector<2x16x32xf32>
    %21 = arith.cmpf oge, %0, %20 : vector<2x16x32xf32>
    %cst_10 = arith.constant 1.000000e+00 : f32
    %22 = vector.broadcast %cst_10 : f32 to vector<2x16x32xf32>
    %23 = arith.subf %22, %19 : vector<2x16x32xf32>
    %24 = arith.select %21, %19, %23 : vector<2x16x32xi1>, vector<2x16x32xf32>
    %cst_11 = arith.constant 1.000000e+00 : f32
    %25 = vector.broadcast %cst_11 : f32 to vector<2x16x32xf32>
    %26 = arith.subf %25, %24 : vector<2x16x32xf32>
    %27 = arith.select %5, %24, %26 : vector<2x16x32xi1>, vector<2x16x32xf32>
    %cst_12 = arith.constant 1.000000e+00 : f32
    %28 = vector.broadcast %cst_12 : f32 to vector<2x16x32xf32>
    %29 = arith.subf %28, %27 : vector<2x16x32xf32>
    %30 = arith.mulf %29, %29 : vector<2x16x32xf32>
    %31 = arith.mulf %16, %30 : vector<2x16x32xf32>
    %cst_13 = arith.constant 2.500000e-01 : f32
    %cst_14 = arith.constant 7.500000e-01 : f32
    %32 = vector.broadcast %cst_13 : f32 to vector<2x16x32xf32>
    %33 = vector.broadcast %cst_14 : f32 to vector<2x16x32xf32>
    %34 = arith.select %5, %32, %33 : vector<2x16x32xi1>, vector<2x16x32xf32>
    %35 = arith.mulf %31, %34 : vector<2x16x32xf32>
    %36 = vector.shape_cast %35 : vector<2x16x32xf32> to vector<1x2x16x32xf32>
    %cst_15 = arith.constant dense<0.000000e+00> : vector<1xf32>
    %37 = vector.multi_reduction <add>, %36, %cst_15 [1, 2, 3] : vector<1x2x16x32xf32> to vector<1xf32>
    %38 = vector.shape_cast %37 : vector<1xf32> to vector<1x1x1x1xf32>
    %39 = vector.extract %38[0, 0, 0, 0] : f32 from vector<1x1x1x1xf32>
    %c0_16 = arith.constant 0 : index
    %40 = arith.index_cast %arg0 : i32 to index
    %41 = memref.load %arg6[%c0_16, %40] : memref<4x1xf32, #tpu.memory_space<smem>>
    memref.store %39, %arg6[%c0_16, %40] : memref<4x1xf32, #tpu.memory_space<smem>>
    %42 = vector.extract_strided_slice %0 {offsets = [0, 0, 31], sizes = [2, 16, 1], strides = [1, 1, 1]} : vector<2x16x32xf32> to vector<2x16x1xf32>
    %c31_i32 = arith.constant 31 : i32
    %43 = vector.broadcast %c31_i32 : i32 to vector<2x16x32xi32>
    %44 = arith.cmpi eq, %3, %43 : vector<2x16x32xi32>
    %cst_17 = arith.constant -3.000000e+38 : f32
    %45 = vector.broadcast %cst_17 : f32 to vector<2x16x32xf32>
    %46 = arith.select %44, %45, %0 : vector<2x16x32xi1>, vector<2x16x32xf32>
    %cst_18 = arith.constant dense<0xFF800000> : vector<2x16xf32>
    %47 = vector.multi_reduction <maximumf>, %46, %cst_18 [2] : vector<2x16x32xf32> to vector<2x16xf32>
    %48 = vector.shape_cast %47 : vector<2x16xf32> to vector<2x16x1xf32>
    %49 = arith.cmpf oge, %48, %42 : vector<2x16x1xf32>
    %50 = arith.extui %49 : vector<2x16x1xi1> to vector<2x16x1xi32>
    %51 = arith.sitofp %50 : vector<2x16x1xi32> to vector<2x16x1xf32>
    %52 = vector.extract_strided_slice %51 {offsets = [0, 0, 0], sizes = [1, 16, 1], strides = [1, 1, 1]} : vector<2x16x1xf32> to vector<1x16x1xf32>
    %53 = vector.shape_cast %52 : vector<1x16x1xf32> to vector<16x1xf32>
    %54 = vector.shape_cast %53 : vector<16x1xf32> to vector<1x16x1xf32>
    %cst_19 = arith.constant dense<0.000000e+00> : vector<1xf32>
    %55 = vector.multi_reduction <add>, %54, %cst_19 [1, 2] : vector<1x16x1xf32> to vector<1xf32>
    %56 = vector.shape_cast %55 : vector<1xf32> to vector<1x1x1xf32>
    %57 = vector.extract %56[0, 0, 0] : f32 from vector<1x1x1xf32>
    %c0_i32 = arith.constant 0 : i32
    %58 = arith.addi %c0_i32, %arg0 : i32
    %c0_20 = arith.constant 0 : index
    %59 = arith.index_cast %58 : i32 to index
    %60 = memref.load %arg7[%c0_20, %59] : memref<4x2xf32, #tpu.memory_space<smem>>
    memref.store %57, %arg7[%c0_20, %59] : memref<4x2xf32, #tpu.memory_space<smem>>
    %61 = vector.extract_strided_slice %51 {offsets = [1, 0, 0], sizes = [1, 16, 1], strides = [1, 1, 1]} : vector<2x16x1xf32> to vector<1x16x1xf32>
    %62 = vector.shape_cast %61 : vector<1x16x1xf32> to vector<16x1xf32>
    %63 = vector.shape_cast %62 : vector<16x1xf32> to vector<1x16x1xf32>
    %cst_21 = arith.constant dense<0.000000e+00> : vector<1xf32>
    %64 = vector.multi_reduction <add>, %63, %cst_21 [1, 2] : vector<1x16x1xf32> to vector<1xf32>
    %65 = vector.shape_cast %64 : vector<1xf32> to vector<1x1x1xf32>
    %66 = vector.extract %65[0, 0, 0] : f32 from vector<1x1x1xf32>
    %c1_i32 = arith.constant 1 : i32
    %67 = arith.addi %c1_i32, %arg0 : i32
    %c0_22 = arith.constant 0 : index
    %68 = arith.index_cast %67 : i32 to index
    %69 = memref.load %arg7[%c0_22, %68] : memref<4x2xf32, #tpu.memory_space<smem>>
    memref.store %66, %arg7[%c0_22, %68] : memref<4x2xf32, #tpu.memory_space<smem>>
    %c0_23 = arith.constant 0 : index
    %c0_24 = arith.constant 0 : index
    %c0_25 = arith.constant 0 : index
    %70 = vector.load %arg2[%c0_23, %c0_24, %c0_25] : memref<2x16x32xf32, #tpu.memory_space<vmem>>, vector<2x16x32xf32>
    %c1 = arith.constant 1 : index
    %c0_26 = arith.constant 0 : index
    %c0_27 = arith.constant 0 : index
    %c0_28 = arith.constant 0 : index
    %71 = vector.load %arg5[%c1, %c0_26, %c0_27, %c0_28] : memref<4x2x16x1xi32, #tpu.memory_space<vmem>>, vector<1x2x16x1xi32>
    %72 = vector.shape_cast %71 : vector<1x2x16x1xi32> to vector<2x16x1xi32>
    %73 = tpu.iota {dimensions = array<i32: 2>} : vector<2x16x32xi32>
    %74 = vector.broadcast %72 : vector<2x16x1xi32> to vector<2x16x32xi32>
    %75 = arith.cmpi eq, %73, %74 : vector<2x16x32xi32>
    %76 = math.absf %70 : vector<2x16x32xf32>
    %cst_29 = arith.constant 0.000000e+00 : f32
    %77 = vector.broadcast %cst_29 : f32 to vector<2x16x32xf32>
    %78 = arith.subf %77, %76 : vector<2x16x32xf32>
    %79 = math.exp %78 : vector<2x16x32xf32>
    %cst_30 = arith.constant 0.000000e+00 : f32
    %80 = vector.broadcast %cst_30 : f32 to vector<2x16x32xf32>
    %81 = arith.maximumf %70, %80 : vector<2x16x32xf32>
    %cst_31 = arith.constant 0.000000e+00 : f32
    %82 = vector.broadcast %cst_31 : f32 to vector<2x16x32xf32>
    %83 = arith.select %75, %70, %82 : vector<2x16x32xi1>, vector<2x16x32xf32>
    %84 = arith.subf %81, %83 : vector<2x16x32xf32>
    %85 = math.log1p %79 : vector<2x16x32xf32>
    %86 = arith.addf %84, %85 : vector<2x16x32xf32>
    %cst_32 = arith.constant 1.000000e+00 : f32
    %87 = vector.broadcast %cst_32 : f32 to vector<2x16x32xf32>
    %88 = arith.addf %87, %79 : vector<2x16x32xf32>
    %89 = tpu.reciprocal %88 {approx = true} : vector<2x16x32xf32> -> vector<2x16x32xf32>
    %cst_33 = arith.constant 0.000000e+00 : f32
    %90 = vector.broadcast %cst_33 : f32 to vector<2x16x32xf32>
    %91 = arith.cmpf oge, %70, %90 : vector<2x16x32xf32>
    %cst_34 = arith.constant 1.000000e+00 : f32
    %92 = vector.broadcast %cst_34 : f32 to vector<2x16x32xf32>
    %93 = arith.subf %92, %89 : vector<2x16x32xf32>
    %94 = arith.select %91, %89, %93 : vector<2x16x32xi1>, vector<2x16x32xf32>
    %cst_35 = arith.constant 1.000000e+00 : f32
    %95 = vector.broadcast %cst_35 : f32 to vector<2x16x32xf32>
    %96 = arith.subf %95, %94 : vector<2x16x32xf32>
    %97 = arith.select %75, %94, %96 : vector<2x16x32xi1>, vector<2x16x32xf32>
    %cst_36 = arith.constant 1.000000e+00 : f32
    %98 = vector.broadcast %cst_36 : f32 to vector<2x16x32xf32>
    %99 = arith.subf %98, %97 : vector<2x16x32xf32>
    %100 = arith.mulf %99, %99 : vector<2x16x32xf32>
    %101 = arith.mulf %86, %100 : vector<2x16x32xf32>
    %cst_37 = arith.constant 2.500000e-01 : f32
    %cst_38 = arith.constant 7.500000e-01 : f32
    %102 = vector.broadcast %cst_37 : f32 to vector<2x16x32xf32>
    %103 = vector.broadcast %cst_38 : f32 to vector<2x16x32xf32>
    %104 = arith.select %75, %102, %103 : vector<2x16x32xi1>, vector<2x16x32xf32>
    %105 = arith.mulf %101, %104 : vector<2x16x32xf32>
    %106 = vector.shape_cast %105 : vector<2x16x32xf32> to vector<1x2x16x32xf32>
    %cst_39 = arith.constant dense<0.000000e+00> : vector<1xf32>
    %107 = vector.multi_reduction <add>, %106, %cst_39 [1, 2, 3] : vector<1x2x16x32xf32> to vector<1xf32>
    %108 = vector.shape_cast %107 : vector<1xf32> to vector<1x1x1x1xf32>
    %109 = vector.extract %108[0, 0, 0, 0] : f32 from vector<1x1x1x1xf32>
    %c1_40 = arith.constant 1 : index
    %110 = arith.index_cast %arg0 : i32 to index
    %111 = memref.load %arg6[%c1_40, %110] : memref<4x1xf32, #tpu.memory_space<smem>>
    memref.store %109, %arg6[%c1_40, %110] : memref<4x1xf32, #tpu.memory_space<smem>>
    %112 = vector.extract_strided_slice %70 {offsets = [0, 0, 31], sizes = [2, 16, 1], strides = [1, 1, 1]} : vector<2x16x32xf32> to vector<2x16x1xf32>
    %c31_i32_41 = arith.constant 31 : i32
    %113 = vector.broadcast %c31_i32_41 : i32 to vector<2x16x32xi32>
    %114 = arith.cmpi eq, %73, %113 : vector<2x16x32xi32>
    %cst_42 = arith.constant -3.000000e+38 : f32
    %115 = vector.broadcast %cst_42 : f32 to vector<2x16x32xf32>
    %116 = arith.select %114, %115, %70 : vector<2x16x32xi1>, vector<2x16x32xf32>
    %cst_43 = arith.constant dense<0xFF800000> : vector<2x16xf32>
    %117 = vector.multi_reduction <maximumf>, %116, %cst_43 [2] : vector<2x16x32xf32> to vector<2x16xf32>
    %118 = vector.shape_cast %117 : vector<2x16xf32> to vector<2x16x1xf32>
    %119 = arith.cmpf oge, %118, %112 : vector<2x16x1xf32>
    %120 = arith.extui %119 : vector<2x16x1xi1> to vector<2x16x1xi32>
    %121 = arith.sitofp %120 : vector<2x16x1xi32> to vector<2x16x1xf32>
    %122 = vector.extract_strided_slice %121 {offsets = [0, 0, 0], sizes = [1, 16, 1], strides = [1, 1, 1]} : vector<2x16x1xf32> to vector<1x16x1xf32>
    %123 = vector.shape_cast %122 : vector<1x16x1xf32> to vector<16x1xf32>
    %124 = vector.shape_cast %123 : vector<16x1xf32> to vector<1x16x1xf32>
    %cst_44 = arith.constant dense<0.000000e+00> : vector<1xf32>
    %125 = vector.multi_reduction <add>, %124, %cst_44 [1, 2] : vector<1x16x1xf32> to vector<1xf32>
    %126 = vector.shape_cast %125 : vector<1xf32> to vector<1x1x1xf32>
    %127 = vector.extract %126[0, 0, 0] : f32 from vector<1x1x1xf32>
    %c0_i32_45 = arith.constant 0 : i32
    %128 = arith.addi %c0_i32_45, %arg0 : i32
    %c1_46 = arith.constant 1 : index
    %129 = arith.index_cast %128 : i32 to index
    %130 = memref.load %arg7[%c1_46, %129] : memref<4x2xf32, #tpu.memory_space<smem>>
    memref.store %127, %arg7[%c1_46, %129] : memref<4x2xf32, #tpu.memory_space<smem>>
    %131 = vector.extract_strided_slice %121 {offsets = [1, 0, 0], sizes = [1, 16, 1], strides = [1, 1, 1]} : vector<2x16x1xf32> to vector<1x16x1xf32>
    %132 = vector.shape_cast %131 : vector<1x16x1xf32> to vector<16x1xf32>
    %133 = vector.shape_cast %132 : vector<16x1xf32> to vector<1x16x1xf32>
    %cst_47 = arith.constant dense<0.000000e+00> : vector<1xf32>
    %134 = vector.multi_reduction <add>, %133, %cst_47 [1, 2] : vector<1x16x1xf32> to vector<1xf32>
    %135 = vector.shape_cast %134 : vector<1xf32> to vector<1x1x1xf32>
    %136 = vector.extract %135[0, 0, 0] : f32 from vector<1x1x1xf32>
    %c1_i32_48 = arith.constant 1 : i32
    %137 = arith.addi %c1_i32_48, %arg0 : i32
    %c1_49 = arith.constant 1 : index
    %138 = arith.index_cast %137 : i32 to index
    %139 = memref.load %arg7[%c1_49, %138] : memref<4x2xf32, #tpu.memory_space<smem>>
    memref.store %136, %arg7[%c1_49, %138] : memref<4x2xf32, #tpu.memory_space<smem>>
    %c0_50 = arith.constant 0 : index
    %c0_51 = arith.constant 0 : index
    %c0_52 = arith.constant 0 : index
    %140 = vector.load %arg3[%c0_50, %c0_51, %c0_52] : memref<2x16x32xf32, #tpu.memory_space<vmem>>, vector<2x16x32xf32>
    %c2 = arith.constant 2 : index
    %c0_53 = arith.constant 0 : index
    %c0_54 = arith.constant 0 : index
    %c0_55 = arith.constant 0 : index
    %141 = vector.load %arg5[%c2, %c0_53, %c0_54, %c0_55] : memref<4x2x16x1xi32, #tpu.memory_space<vmem>>, vector<1x2x16x1xi32>
    %142 = vector.shape_cast %141 : vector<1x2x16x1xi32> to vector<2x16x1xi32>
    %143 = tpu.iota {dimensions = array<i32: 2>} : vector<2x16x32xi32>
    %144 = vector.broadcast %142 : vector<2x16x1xi32> to vector<2x16x32xi32>
    %145 = arith.cmpi eq, %143, %144 : vector<2x16x32xi32>
    %146 = math.absf %140 : vector<2x16x32xf32>
    %cst_56 = arith.constant 0.000000e+00 : f32
    %147 = vector.broadcast %cst_56 : f32 to vector<2x16x32xf32>
    %148 = arith.subf %147, %146 : vector<2x16x32xf32>
    %149 = math.exp %148 : vector<2x16x32xf32>
    %cst_57 = arith.constant 0.000000e+00 : f32
    %150 = vector.broadcast %cst_57 : f32 to vector<2x16x32xf32>
    %151 = arith.maximumf %140, %150 : vector<2x16x32xf32>
    %cst_58 = arith.constant 0.000000e+00 : f32
    %152 = vector.broadcast %cst_58 : f32 to vector<2x16x32xf32>
    %153 = arith.select %145, %140, %152 : vector<2x16x32xi1>, vector<2x16x32xf32>
    %154 = arith.subf %151, %153 : vector<2x16x32xf32>
    %155 = math.log1p %149 : vector<2x16x32xf32>
    %156 = arith.addf %154, %155 : vector<2x16x32xf32>
    %cst_59 = arith.constant 1.000000e+00 : f32
    %157 = vector.broadcast %cst_59 : f32 to vector<2x16x32xf32>
    %158 = arith.addf %157, %149 : vector<2x16x32xf32>
    %159 = tpu.reciprocal %158 {approx = true} : vector<2x16x32xf32> -> vector<2x16x32xf32>
    %cst_60 = arith.constant 0.000000e+00 : f32
    %160 = vector.broadcast %cst_60 : f32 to vector<2x16x32xf32>
    %161 = arith.cmpf oge, %140, %160 : vector<2x16x32xf32>
    %cst_61 = arith.constant 1.000000e+00 : f32
    %162 = vector.broadcast %cst_61 : f32 to vector<2x16x32xf32>
    %163 = arith.subf %162, %159 : vector<2x16x32xf32>
    %164 = arith.select %161, %159, %163 : vector<2x16x32xi1>, vector<2x16x32xf32>
    %cst_62 = arith.constant 1.000000e+00 : f32
    %165 = vector.broadcast %cst_62 : f32 to vector<2x16x32xf32>
    %166 = arith.subf %165, %164 : vector<2x16x32xf32>
    %167 = arith.select %145, %164, %166 : vector<2x16x32xi1>, vector<2x16x32xf32>
    %cst_63 = arith.constant 1.000000e+00 : f32
    %168 = vector.broadcast %cst_63 : f32 to vector<2x16x32xf32>
    %169 = arith.subf %168, %167 : vector<2x16x32xf32>
    %170 = arith.mulf %169, %169 : vector<2x16x32xf32>
    %171 = arith.mulf %156, %170 : vector<2x16x32xf32>
    %cst_64 = arith.constant 2.500000e-01 : f32
    %cst_65 = arith.constant 7.500000e-01 : f32
    %172 = vector.broadcast %cst_64 : f32 to vector<2x16x32xf32>
    %173 = vector.broadcast %cst_65 : f32 to vector<2x16x32xf32>
    %174 = arith.select %145, %172, %173 : vector<2x16x32xi1>, vector<2x16x32xf32>
    %175 = arith.mulf %171, %174 : vector<2x16x32xf32>
    %176 = vector.shape_cast %175 : vector<2x16x32xf32> to vector<1x2x16x32xf32>
    %cst_66 = arith.constant dense<0.000000e+00> : vector<1xf32>
    %177 = vector.multi_reduction <add>, %176, %cst_66 [1, 2, 3] : vector<1x2x16x32xf32> to vector<1xf32>
    %178 = vector.shape_cast %177 : vector<1xf32> to vector<1x1x1x1xf32>
    %179 = vector.extract %178[0, 0, 0, 0] : f32 from vector<1x1x1x1xf32>
    %c2_67 = arith.constant 2 : index
    %180 = arith.index_cast %arg0 : i32 to index
    %181 = memref.load %arg6[%c2_67, %180] : memref<4x1xf32, #tpu.memory_space<smem>>
    memref.store %179, %arg6[%c2_67, %180] : memref<4x1xf32, #tpu.memory_space<smem>>
    %182 = vector.extract_strided_slice %140 {offsets = [0, 0, 31], sizes = [2, 16, 1], strides = [1, 1, 1]} : vector<2x16x32xf32> to vector<2x16x1xf32>
    %c31_i32_68 = arith.constant 31 : i32
    %183 = vector.broadcast %c31_i32_68 : i32 to vector<2x16x32xi32>
    %184 = arith.cmpi eq, %143, %183 : vector<2x16x32xi32>
    %cst_69 = arith.constant -3.000000e+38 : f32
    %185 = vector.broadcast %cst_69 : f32 to vector<2x16x32xf32>
    %186 = arith.select %184, %185, %140 : vector<2x16x32xi1>, vector<2x16x32xf32>
    %cst_70 = arith.constant dense<0xFF800000> : vector<2x16xf32>
    %187 = vector.multi_reduction <maximumf>, %186, %cst_70 [2] : vector<2x16x32xf32> to vector<2x16xf32>
    %188 = vector.shape_cast %187 : vector<2x16xf32> to vector<2x16x1xf32>
    %189 = arith.cmpf oge, %188, %182 : vector<2x16x1xf32>
    %190 = arith.extui %189 : vector<2x16x1xi1> to vector<2x16x1xi32>
    %191 = arith.sitofp %190 : vector<2x16x1xi32> to vector<2x16x1xf32>
    %192 = vector.extract_strided_slice %191 {offsets = [0, 0, 0], sizes = [1, 16, 1], strides = [1, 1, 1]} : vector<2x16x1xf32> to vector<1x16x1xf32>
    %193 = vector.shape_cast %192 : vector<1x16x1xf32> to vector<16x1xf32>
    %194 = vector.shape_cast %193 : vector<16x1xf32> to vector<1x16x1xf32>
    %cst_71 = arith.constant dense<0.000000e+00> : vector<1xf32>
    %195 = vector.multi_reduction <add>, %194, %cst_71 [1, 2] : vector<1x16x1xf32> to vector<1xf32>
    %196 = vector.shape_cast %195 : vector<1xf32> to vector<1x1x1xf32>
    %197 = vector.extract %196[0, 0, 0] : f32 from vector<1x1x1xf32>
    %c0_i32_72 = arith.constant 0 : i32
    %198 = arith.addi %c0_i32_72, %arg0 : i32
    %c2_73 = arith.constant 2 : index
    %199 = arith.index_cast %198 : i32 to index
    %200 = memref.load %arg7[%c2_73, %199] : memref<4x2xf32, #tpu.memory_space<smem>>
    memref.store %197, %arg7[%c2_73, %199] : memref<4x2xf32, #tpu.memory_space<smem>>
    %201 = vector.extract_strided_slice %191 {offsets = [1, 0, 0], sizes = [1, 16, 1], strides = [1, 1, 1]} : vector<2x16x1xf32> to vector<1x16x1xf32>
    %202 = vector.shape_cast %201 : vector<1x16x1xf32> to vector<16x1xf32>
    %203 = vector.shape_cast %202 : vector<16x1xf32> to vector<1x16x1xf32>
    %cst_74 = arith.constant dense<0.000000e+00> : vector<1xf32>
    %204 = vector.multi_reduction <add>, %203, %cst_74 [1, 2] : vector<1x16x1xf32> to vector<1xf32>
    %205 = vector.shape_cast %204 : vector<1xf32> to vector<1x1x1xf32>
    %206 = vector.extract %205[0, 0, 0] : f32 from vector<1x1x1xf32>
    %c1_i32_75 = arith.constant 1 : i32
    %207 = arith.addi %c1_i32_75, %arg0 : i32
    %c2_76 = arith.constant 2 : index
    %208 = arith.index_cast %207 : i32 to index
    %209 = memref.load %arg7[%c2_76, %208] : memref<4x2xf32, #tpu.memory_space<smem>>
    memref.store %206, %arg7[%c2_76, %208] : memref<4x2xf32, #tpu.memory_space<smem>>
    %c0_77 = arith.constant 0 : index
    %c0_78 = arith.constant 0 : index
    %c0_79 = arith.constant 0 : index
    %210 = vector.load %arg4[%c0_77, %c0_78, %c0_79] : memref<2x16x32xf32, #tpu.memory_space<vmem>>, vector<2x16x32xf32>
    %c3 = arith.constant 3 : index
    %c0_80 = arith.constant 0 : index
    %c0_81 = arith.constant 0 : index
    %c0_82 = arith.constant 0 : index
    %211 = vector.load %arg5[%c3, %c0_80, %c0_81, %c0_82] : memref<4x2x16x1xi32, #tpu.memory_space<vmem>>, vector<1x2x16x1xi32>
    %212 = vector.shape_cast %211 : vector<1x2x16x1xi32> to vector<2x16x1xi32>
    %213 = tpu.iota {dimensions = array<i32: 2>} : vector<2x16x32xi32>
    %214 = vector.broadcast %212 : vector<2x16x1xi32> to vector<2x16x32xi32>
    %215 = arith.cmpi eq, %213, %214 : vector<2x16x32xi32>
    %216 = math.absf %210 : vector<2x16x32xf32>
    %cst_83 = arith.constant 0.000000e+00 : f32
    %217 = vector.broadcast %cst_83 : f32 to vector<2x16x32xf32>
    %218 = arith.subf %217, %216 : vector<2x16x32xf32>
    %219 = math.exp %218 : vector<2x16x32xf32>
    %cst_84 = arith.constant 0.000000e+00 : f32
    %220 = vector.broadcast %cst_84 : f32 to vector<2x16x32xf32>
    %221 = arith.maximumf %210, %220 : vector<2x16x32xf32>
    %cst_85 = arith.constant 0.000000e+00 : f32
    %222 = vector.broadcast %cst_85 : f32 to vector<2x16x32xf32>
    %223 = arith.select %215, %210, %222 : vector<2x16x32xi1>, vector<2x16x32xf32>
    %224 = arith.subf %221, %223 : vector<2x16x32xf32>
    %225 = math.log1p %219 : vector<2x16x32xf32>
    %226 = arith.addf %224, %225 : vector<2x16x32xf32>
    %cst_86 = arith.constant 1.000000e+00 : f32
    %227 = vector.broadcast %cst_86 : f32 to vector<2x16x32xf32>
    %228 = arith.addf %227, %219 : vector<2x16x32xf32>
    %229 = tpu.reciprocal %228 {approx = true} : vector<2x16x32xf32> -> vector<2x16x32xf32>
    %cst_87 = arith.constant 0.000000e+00 : f32
    %230 = vector.broadcast %cst_87 : f32 to vector<2x16x32xf32>
    %231 = arith.cmpf oge, %210, %230 : vector<2x16x32xf32>
    %cst_88 = arith.constant 1.000000e+00 : f32
    %232 = vector.broadcast %cst_88 : f32 to vector<2x16x32xf32>
    %233 = arith.subf %232, %229 : vector<2x16x32xf32>
    %234 = arith.select %231, %229, %233 : vector<2x16x32xi1>, vector<2x16x32xf32>
    %cst_89 = arith.constant 1.000000e+00 : f32
    %235 = vector.broadcast %cst_89 : f32 to vector<2x16x32xf32>
    %236 = arith.subf %235, %234 : vector<2x16x32xf32>
    %237 = arith.select %215, %234, %236 : vector<2x16x32xi1>, vector<2x16x32xf32>
    %cst_90 = arith.constant 1.000000e+00 : f32
    %238 = vector.broadcast %cst_90 : f32 to vector<2x16x32xf32>
    %239 = arith.subf %238, %237 : vector<2x16x32xf32>
    %240 = arith.mulf %239, %239 : vector<2x16x32xf32>
    %241 = arith.mulf %226, %240 : vector<2x16x32xf32>
    %cst_91 = arith.constant 2.500000e-01 : f32
    %cst_92 = arith.constant 7.500000e-01 : f32
    %242 = vector.broadcast %cst_91 : f32 to vector<2x16x32xf32>
    %243 = vector.broadcast %cst_92 : f32 to vector<2x16x32xf32>
    %244 = arith.select %215, %242, %243 : vector<2x16x32xi1>, vector<2x16x32xf32>
    %245 = arith.mulf %241, %244 : vector<2x16x32xf32>
    %246 = vector.shape_cast %245 : vector<2x16x32xf32> to vector<1x2x16x32xf32>
    %cst_93 = arith.constant dense<0.000000e+00> : vector<1xf32>
    %247 = vector.multi_reduction <add>, %246, %cst_93 [1, 2, 3] : vector<1x2x16x32xf32> to vector<1xf32>
    %248 = vector.shape_cast %247 : vector<1xf32> to vector<1x1x1x1xf32>
    %249 = vector.extract %248[0, 0, 0, 0] : f32 from vector<1x1x1x1xf32>
    %c3_94 = arith.constant 3 : index
    %250 = arith.index_cast %arg0 : i32 to index
    %251 = memref.load %arg6[%c3_94, %250] : memref<4x1xf32, #tpu.memory_space<smem>>
    memref.store %249, %arg6[%c3_94, %250] : memref<4x1xf32, #tpu.memory_space<smem>>
    %252 = vector.extract_strided_slice %210 {offsets = [0, 0, 31], sizes = [2, 16, 1], strides = [1, 1, 1]} : vector<2x16x32xf32> to vector<2x16x1xf32>
    %c31_i32_95 = arith.constant 31 : i32
    %253 = vector.broadcast %c31_i32_95 : i32 to vector<2x16x32xi32>
    %254 = arith.cmpi eq, %213, %253 : vector<2x16x32xi32>
    %cst_96 = arith.constant -3.000000e+38 : f32
    %255 = vector.broadcast %cst_96 : f32 to vector<2x16x32xf32>
    %256 = arith.select %254, %255, %210 : vector<2x16x32xi1>, vector<2x16x32xf32>
    %cst_97 = arith.constant dense<0xFF800000> : vector<2x16xf32>
    %257 = vector.multi_reduction <maximumf>, %256, %cst_97 [2] : vector<2x16x32xf32> to vector<2x16xf32>
    %258 = vector.shape_cast %257 : vector<2x16xf32> to vector<2x16x1xf32>
    %259 = arith.cmpf oge, %258, %252 : vector<2x16x1xf32>
    %260 = arith.extui %259 : vector<2x16x1xi1> to vector<2x16x1xi32>
    %261 = arith.sitofp %260 : vector<2x16x1xi32> to vector<2x16x1xf32>
    %262 = vector.extract_strided_slice %261 {offsets = [0, 0, 0], sizes = [1, 16, 1], strides = [1, 1, 1]} : vector<2x16x1xf32> to vector<1x16x1xf32>
    %263 = vector.shape_cast %262 : vector<1x16x1xf32> to vector<16x1xf32>
    %264 = vector.shape_cast %263 : vector<16x1xf32> to vector<1x16x1xf32>
    %cst_98 = arith.constant dense<0.000000e+00> : vector<1xf32>
    %265 = vector.multi_reduction <add>, %264, %cst_98 [1, 2] : vector<1x16x1xf32> to vector<1xf32>
    %266 = vector.shape_cast %265 : vector<1xf32> to vector<1x1x1xf32>
    %267 = vector.extract %266[0, 0, 0] : f32 from vector<1x1x1xf32>
    %c0_i32_99 = arith.constant 0 : i32
    %268 = arith.addi %c0_i32_99, %arg0 : i32
    %c3_100 = arith.constant 3 : index
    %269 = arith.index_cast %268 : i32 to index
    %270 = memref.load %arg7[%c3_100, %269] : memref<4x2xf32, #tpu.memory_space<smem>>
    memref.store %267, %arg7[%c3_100, %269] : memref<4x2xf32, #tpu.memory_space<smem>>
    %271 = vector.extract_strided_slice %261 {offsets = [1, 0, 0], sizes = [1, 16, 1], strides = [1, 1, 1]} : vector<2x16x1xf32> to vector<1x16x1xf32>
    %272 = vector.shape_cast %271 : vector<1x16x1xf32> to vector<16x1xf32>
    %273 = vector.shape_cast %272 : vector<16x1xf32> to vector<1x16x1xf32>
    %cst_101 = arith.constant dense<0.000000e+00> : vector<1xf32>
    %274 = vector.multi_reduction <add>, %273, %cst_101 [1, 2] : vector<1x16x1xf32> to vector<1xf32>
    %275 = vector.shape_cast %274 : vector<1xf32> to vector<1x1x1xf32>
    %276 = vector.extract %275[0, 0, 0] : f32 from vector<1x1x1xf32>
    %c1_i32_102 = arith.constant 1 : i32
    %277 = arith.addi %c1_i32_102, %arg0 : i32
    %c3_103 = arith.constant 3 : index
    %278 = arith.index_cast %277 : i32 to index
    %279 = memref.load %arg7[%c3_103, %278] : memref<4x2xf32, #tpu.memory_space<smem>>
    memref.store %276, %arg7[%c3_103, %278] : memref<4x2xf32, #tpu.memory_space<smem>>
    return
  }
  func.func @transform_0(%arg0: i32) -> (i32, i32, i32) {
    %c0_i32 = arith.constant 0 : i32
    %c0_i32_0 = arith.constant 0 : i32
    %c0_i32_1 = arith.constant 0 : i32
    return %c0_i32, %arg0, %c0_i32_0 : i32, i32, i32
  }
  func.func @transform_1(%arg0: i32) -> (i32, i32, i32) {
    %c0_i32 = arith.constant 0 : i32
    %c0_i32_0 = arith.constant 0 : i32
    %c0_i32_1 = arith.constant 0 : i32
    return %c0_i32, %arg0, %c0_i32_0 : i32, i32, i32
  }
  func.func @transform_2(%arg0: i32) -> (i32, i32, i32) {
    %c0_i32 = arith.constant 0 : i32
    %c0_i32_0 = arith.constant 0 : i32
    %c0_i32_1 = arith.constant 0 : i32
    return %c0_i32, %arg0, %c0_i32_0 : i32, i32, i32
  }
  func.func @transform_3(%arg0: i32) -> (i32, i32, i32) {
    %c0_i32 = arith.constant 0 : i32
    %c0_i32_0 = arith.constant 0 : i32
    %c0_i32_1 = arith.constant 0 : i32
    return %c0_i32, %arg0, %c0_i32_0 : i32, i32, i32
  }
  func.func @transform_4(%arg0: i32) -> (i32, i32, i32, i32) {
    %c0_i32 = arith.constant 0 : i32
    %c0_i32_0 = arith.constant 0 : i32
    %c0_i32_1 = arith.constant 0 : i32
    %c0_i32_2 = arith.constant 0 : i32
    return %c0_i32, %c0_i32_0, %arg0, %c0_i32_1 : i32, i32, i32, i32
  }
  func.func @transform_5(%arg0: i32) -> (i32, i32) {
    %c0_i32 = arith.constant 0 : i32
    %c0_i32_0 = arith.constant 0 : i32
    %c0_i32_1 = arith.constant 0 : i32
    return %c0_i32, %c0_i32_0 : i32, i32
  }
  func.func @transform_6(%arg0: i32) -> (i32, i32) {
    %c0_i32 = arith.constant 0 : i32
    %c0_i32_0 = arith.constant 0 : i32
    %c0_i32_1 = arith.constant 0 : i32
    return %c0_i32, %c0_i32_0 : i32, i32
  }
}

</mosaic_0001>

<bundles_post_ra>
// kernel: tpu_custom_call.1
= control target key start
LH: loop header
LB: loop body
LE: loop exit
PB: predicated region body
PF: predicated region fallthrough
CT: control target
= control target key end

     0   :  { %12 = vsyncpa [#allocation3], 0  ;;  %v32_v1 = vlaneseq  ;;  %v1255_v2 = vmov 0   ;;  %vm166_vm0 = vcmask 261120   ;;  %s2225_s0 = inlined_call_operand.vmem [shape: f32[2,16,32], index: 0, kind: input, shape index: {}]   ;;  %s2226_s1 = inlined_call_operand.vmem [shape: f32[2,16,32], index: 1, kind: input, shape index: {}]   ;;  %s2227_s2 = inlined_call_operand.vmem [shape: f32[2,16,32], index: 2, kind: input, shape index: {}]   ;;  %s2228_s3 = inlined_call_operand.vmem [shape: f32[2,16,32], index: 3, kind: input, shape index: {}]   ;;  %s2229_s4 = inlined_call_operand.vmem [shape: s32[4,2,16,1], index: 4, kind: input, shape index: {}]   ;;  %s2230_s5 = inlined_call_operand.vmem [shape: f32[4,1], index: 5, kind: output, shape index: {0}]   ;;  %s2231_s6 = inlined_call_operand.vmem [shape: f32[4,2], index: 6, kind: output, shape index: {1}]  }
   0x1   :  { %v28_v0 = vld [vmem:[%s2229_s4] sm:$0xff]  ;;  %1081 = vset.pattern.permute.xlu0 %v1255_v2  ;;  %1082 = vset.pattern.permute.xlu1 %v1255_v2  ;;  %v1309_v5 = vld [vmem:[%s2225_s0 + $0x18] sm:$0xff]  ;;  %v29_v6 = vld [vmem:[%s2229_s4 + $0x8] sm:$0xff] }
   0x2   :  { %35 = vperm.xlu0 %1081, %v28_v0   ;;  %v1302_v3 = vld [vmem:[%s2225_s0] sm:$0xff]  ;;  %v1304_v4 = vand.u32 127, %v32_v1 }
   0x4   :  { %vm185_vm1 = vcmp.eq.s32.totalorder %v1304_v4, 31 }
   0x5   :  { %v186_v7 = vsel %vm185_vm1, -3e+38, %v1302_v3  ;;  %v189_v8 = vsel %vm185_vm1, -3e+38, %v1309_v5 }
   0x6   :  { %38 = vperm.xlu0 %1081, %v29_v6   ;;  %v190_v9 = vsel %vm166_vm0, %v186_v7, -inf  ;;  %v199_v10 = vsel %vm166_vm0, %v189_v8, -inf }
   0x7   :  { %191 = vmax.xlane.f32.xlu1 %v190_v9 }
   0xb   :  { %200 = vmax.xlane.f32.xlu1 %v199_v10 }
   0xc   :  { %13 = vsyncpa [#allocation5], 0  ;;  %v30_v11 = vld [vmem:[%s2229_s4 + $0x10] sm:$0xff]  ;;  %v1329_v12 = vld [vmem:[%s2225_s0 + $0x8] sm:$0xff]  ;;  %v50_v49 = vand.u32 2147483647, %v1302_v3 }
   0xd   :  { %v31_v13 = vld [vmem:[%s2229_s4 + $0x18] sm:$0xff]  ;;  %v187_v14 = vsel %vm185_vm1, -3e+38, %v1329_v12  ;;  %v1340_v15 = vld [vmem:[%s2225_s0 + $0x10] sm:$0xff]  ;;  %v1027_v16 = vld [vmem:[%s2229_s4 + $0x20] sm:$0xff]  ;;  %vm126_vm2 = vcmp.ge.f32.partialorder %v1302_v3, 0.0 }
   0xe   :  { %v193_v17 = vsel %vm166_vm0, %v187_v14, -inf  ;;  %v188_v18 = vsel %vm185_vm1, -3e+38, %v1340_v15  ;;  %v1352_v19 = vld [vmem:[%s2226_s1] sm:$0xff]  ;;  %v1028_v20 = vld [vmem:[%s2229_s4 + $0x28] sm:$0xff]  ;;  %v1029_v24 = vld [vmem:[%s2229_s4 + $0x30] sm:$0xff] }
   0xf   :  { %v196_v21 = vsel %vm166_vm0, %v188_v18, -inf  ;;  %v422_v22 = vsel %vm185_vm1, -3e+38, %v1352_v19  ;;  %v1364_v23 = vld [vmem:[%s2226_s1 + $0x8] sm:$0xff]  ;;  %v1376_v27 = vld [vmem:[%s2226_s1 + $0x10] sm:$0xff]  ;;  %v1030_v28 = vld [vmem:[%s2229_s4 + $0x38] sm:$0xff] }
  0x10   :  { %v426_v25 = vsel %vm166_vm0, %v422_v22, -inf  ;;  %v423_v26 = vsel %vm185_vm1, -3e+38, %v1364_v23  ;;  %v424_v30 = vsel %vm185_vm1, -3e+38, %v1376_v27  ;;  %v1388_v31 = vld [vmem:[%s2226_s1 + $0x18] sm:$0xff] }
  0x11   :  { %v429_v29 = vsel %vm166_vm0, %v423_v26, -inf  ;;  %v432_v32 = vsel %vm166_vm0, %v424_v30, -inf  ;;  %v425_v33 = vsel %vm185_vm1, -3e+38, %v1388_v31  ;;  %v1397_v34 = vld [vmem:[%s2228_s3] sm:$0xff]  ;;  %v1415_v40 = vld [vmem:[%s2227_s2 + $0x8] sm:$0xff] }
  0x12   :  { %v435_v35 = vsel %vm166_vm0, %v425_v33, -inf  ;;  %v900_v36 = vsel %vm185_vm1, -3e+38, %v1397_v34  ;;  %v1407_v38 = vld [vmem:[%s2227_s2] sm:$0xff]  ;;  %v664_v42 = vsel %vm185_vm1, -3e+38, %v1415_v40 }
  0x13   :  { %v904_v37 = vsel %vm166_vm0, %v900_v36, -inf  ;;  %v663_v39 = vsel %vm185_vm1, -3e+38, %v1407_v38  ;;  %v1424_v43 = vld [vmem:[%s2227_s2 + $0x10] sm:$0xff]  ;;  %v670_v44 = vsel %vm166_vm0, %v664_v42, -inf  ;;  %v1433_v46 = vld [vmem:[%s2227_s2 + $0x18] sm:$0xff] }
  0x14   :  { %v667_v41 = vsel %vm166_vm0, %v663_v39, -inf  ;;  %v665_v45 = vsel %vm185_vm1, -3e+38, %v1424_v43  ;;  %v666_v48 = vsel %vm185_vm1, -3e+38, %v1433_v46  ;;  %v1443_v50 = vld [vmem:[%s2228_s3 + $0x8] sm:$0xff] }
  0x15   :  { %v673_v47 = vsel %vm166_vm0, %v665_v45, -inf  ;;  %v51_v51 = vand.u32 2147483647, %v1329_v12  ;;  %v676_v52 = vsel %vm166_vm0, %v666_v48, -inf  ;;  %v901_v53 = vsel %vm185_vm1, -3e+38, %v1443_v50 }
  0x16   :  { %v54_v54 = vsub.f32 0.0, %v50_v49  ;;  %v1453_v55 = vld [vmem:[%s2228_s3 + $0x10] sm:$0xff]  ;;  %v907_v57 = vsel %vm166_vm0, %v901_v53, -inf  ;;  %v1462_v60 = vld [vmem:[%s2228_s3 + $0x18] sm:$0xff]  ;;  %v52_v0 = vand.u32 2147483647, %v1340_v15 }
  0x17   :  { %v55_v56 = vsub.f32 0.0, %v51_v51  ;;  %v902_v58 = vsel %vm185_vm1, -3e+38, %v1453_v55  ;;  %v903_v63 = vsel %vm185_vm1, -3e+38, %v1462_v60  ;;  %vm127_vm3 = vcmp.ge.f32.partialorder %v1329_v12, 0.0 }
  0x18   :  { %v58_v59 = vmul.f32 1.442695, %v54_v54  ;;  %v910_v62 = vsel %vm166_vm0, %v902_v58, -inf  ;;  %v913_v1 = vsel %vm166_vm0, %v903_v63, -inf  ;;  %v53_v2 = vand.u32 2147483647, %v1309_v5 }
  0x19   :  { %v60_v61 = vmul.f32 1.442695, %v55_v56  ;;  %v56_v6 = vsub.f32 0.0, %v52_v0  ;;  %v285_v10 = vand.u32 2147483647, %v1352_v19  ;;  %v66_v58 = vmax.f32 %v1302_v3, 0.0 }
  0x1a   :  { %1123 = vpow2.f32 %v58_v59  ;;  %v57_v7 = vsub.f32 0.0, %v53_v2  ;;  %v286_v14 = vand.u32 2147483647, %v1364_v23  ;;  %v287_v18 = vand.u32 2147483647, %v1376_v27  ;;  %s1258_s18 = smov 97  }
  0x1b   :  { %1125 = vpow2.f32 %v60_v61  ;;  %v62_v9 = vmul.f32 1.442695, %v56_v6  ;;  %v67_v61 = vmax.f32 %v1329_v12, 0.0  ;;  %vm128_vm6 = vcmp.ge.f32.partialorder %v1340_v15, 0.0  ;;  %s981_s29 = sshll.u32 %s2230_s5, 4  ;;  %s982_s29 = int_to_ptr.vmem [resolvable:$true] %s981_s29 }
  0x1c   :  { %41 = vperm.xlu1 %1082, %v30_v11   ;;  %vm129_vm10 = vcmp.ge.f32.partialorder %v1309_v5, 0.0  ;;  %vm361_vm13 = vcmp.ge.f32.partialorder %v1352_v19, 0.0  ;;  %vm362_vm14 = vcmp.ge.f32.partialorder %v1364_v23, 0.0  ;;  %vm363_vm15 = vcmp.ge.f32.partialorder %v1376_v27, 0.0  ;;  %s1227_s12 = scalar_lea.vmem %s982_s29, 64  ;;  %p1232_p1 = scmp.lt.s32.totalorder %s982_s29, %s982_s29 }
  0x1d   :  { %1127 = vpow2.f32 %v62_v9  ;;  %p1228_p0 = scmp.ne.s32.totalorder %s982_s29, %s1227_s12  ;;  %p1233_p2 = scmp.lt.s32.totalorder %s1227_s12, %s1227_s12 }
  0x1f   :  { %p1234_p3 = por %p1233_p2, %p1232_p1 }
  0x20   :  { %44 = vperm.xlu1 %1082, %v31_v13   ;;  %v64_v13 = vmul.f32 1.442695, %v57_v7 }
  0x21   :  { %p1235_p4 = pnand %p1234_p3, %p1228_p0 }
  0x22   :  { %1129 = vpow2.f32 %v64_v13 }
  0x24   :  { %270 = vperm.xlu1 %1082, %v1027_v16   ;;  %v1124_v8 = vpop.eup %1123 }
  0x25   :  { %194 = vmax.xlane.f32.xlu0 %v193_v17  ;;  %v1126_v11 = vpop.eup %1125  ;;  %v78_v16 = vadd.f32 1.0, %v1124_v8  ;;  %v289_v17 = vsub.f32 0.0, %v285_v10  ;;  %v84_v48 = vand.u32 2147483647, %v1124_v8  ;;  %v68_v10 = vmax.f32 %v1340_v15, 0.0 }
  0x26   :  { %v93_v54 = vand.u32 2147483647, %v1126_v11 }
  0x27   :  { %1131 = vrcp.f32 %v78_v16  ;;  %v293_v22 = vmul.f32 1.442695, %v289_v17  ;;  %v1128_v30 = vpop.eup %1127  ;;  %vm1491_vm4 = vcmp.lt.f32.partialorder %v84_v48, 0.0004427343  ;;  %v69_v17 = vmax.f32 %v1309_v5, 0.0 }
  0x28   :  { %273 = vperm.xlu1 %1082, %v1028_v20   ;;  %v87_v20 = vadd.f32 1.0, %v1126_v11  ;;  %v99_v42 = vmul.f32 -0.5, %v1128_v30  ;;  %vm1502_vm5 = vcmp.lt.f32.partialorder %v93_v54, 0.0004427343  ;;  %v102_v13 = vand.u32 2147483647, %v1128_v30 }
  0x29   :  { %197 = vmax.xlane.f32.xlu0 %v196_v21  ;;  %v290_v21 = vsub.f32 0.0, %v286_v14 }
  0x2a   :  { %1133 = vrcp.f32 %v87_v20  ;;  %v100_v56 = vadd.f32 1.0, %v99_v42  ;;  %vm1520_vm9 = vcmp.lt.f32.partialorder %v102_v13, 0.0004427343 }
  0x2b   :  { %v295_v26 = vmul.f32 1.442695, %v290_v21  ;;  %1135 = vpow2.f32 %v293_v22 }
  0x2c   :  { %276 = vperm.xlu1 %1082, %v1029_v24   ;;  %v291_v24 = vsub.f32 0.0, %v287_v18 }
  0x2d   :  { %427 = vmax.xlane.f32.xlu0 %v426_v25  ;;  %v288_v25 = vand.u32 2147483647, %v1388_v31  ;;  %1137 = vpow2.f32 %v295_v26 }
  0x30   :  { %279 = vperm.xlu1 %1082, %v1030_v28   ;;  %v297_v28 = vmul.f32 1.442695, %v291_v24 }
  0x31   :  { %430 = vmax.xlane.f32.xlu0 %v429_v29  ;;  %v292_v29 = vsub.f32 0.0, %v288_v25 }
  0x32   :  { %1139 = vpow2.f32 %v297_v28 }
  0x33   :  { %v299_v33 = vmul.f32 1.442695, %v292_v29  ;;  %1141 = vlog2.f32 %v78_v16  ;;  %v1507_v16 = vmul.f32 %v1128_v30, %v100_v56  ;;  %v301_v29 = vmax.f32 %v1352_v19, 0.0 }
  0x34   :  { %1143 = vlog2.f32 %v87_v20 }
  0x35   :  { %433 = vmax.xlane.f32.xlu0 %v432_v32  ;;  %v1475_v32 = vpop.eup %1129  ;;  %1145 = vpow2.f32 %v299_v33 }
  0x36   :  { %v1132_v36 = vpop.eup %1131  ;;  %v111_v20 = vand.u32 2147483647, %v1475_v32 }
  0x37   :  { %v1134_v39 = vpop.eup %1133  ;;  %v130_v49 = vsub.f32 1.0, %v1132_v36 }
  0x38   :  { %v131_v51 = vsub.f32 1.0, %v1134_v39  ;;  %vm1546_vm11 = vcmp.lt.f32.partialorder %v111_v20, 0.0004427343 }
  0x39   :  { %436 = vmax.xlane.f32.xlu0 %v435_v35  ;;  %v81_v35 = vmul.f32 -0.5, %v1124_v8  ;;  %v134_v0 = vsel %vm126_vm2, %v1132_v36, %v130_v49 }
  0x3d   :  { %905 = vmax.xlane.f32.xlu0 %v904_v37  ;;  %v96_v37 = vadd.f32 1.0, %v1128_v30 }
  0x3f   :  { %1147 = vrcp.f32 %v96_v37 }
  0x54   :  { %668 = vmax.xlane.f32.xlu1 %v667_v41  ;;  %v90_v41 = vmul.f32 -0.5, %v1126_v11 }
  0x56   :  { %v91_v53 = vadd.f32 1.0, %v90_v41 }
  0x58   :  { %671 = vmax.xlane.f32.xlu1 %v670_v44  ;;  %v105_v44 = vadd.f32 1.0, %v1475_v32 }
  0x5a   :  { %1149 = vrcp.f32 %v105_v44 }
  0x5b   :  { %1151 = vlog2.f32 %v96_v37 }
  0x5c   :  { %674 = vmax.xlane.f32.xlu1 %v673_v47  ;;  %v82_v47 = vadd.f32 1.0, %v81_v35  ;;  %1153 = vlog2.f32 %v105_v44 }
  0x5e   :  { %v1486_v59 = vmul.f32 %v1124_v8, %v82_v47  ;;  %v1500_v8 = vmul.f32 %v1126_v11, %v91_v53  ;;  %v138_v11 = vsub.f32 1.0, %v134_v0 }
  0x60   :  { %677 = vmax.xlane.f32.xlu1 %v676_v52  ;;  %v1480_v52 = vpop.eup %1135 }
  0x61   :  { %v313_v2 = vadd.f32 1.0, %v1480_v52  ;;  %v316_v24 = vmul.f32 -0.5, %v1480_v52  ;;  %v319_v30 = vand.u32 2147483647, %v1480_v52 }
  0x63   :  { %1155 = vlog2.f32 %v313_v2  ;;  %v317_v53 = vadd.f32 1.0, %v316_v24  ;;  %vm1550_vm12 = vcmp.lt.f32.partialorder %v319_v30, 0.0004427343 }
  0x64   :  { %908 = vmax.xlane.f32.xlu1 %v907_v57  ;;  %v108_v57 = vmul.f32 -0.5, %v1475_v32  ;;  %1157 = vrcp.f32 %v313_v2 }
  0x66   :  { %v109_v18 = vadd.f32 1.0, %v108_v57 }
  0x68   :  { %911 = vmax.xlane.f32.xlu1 %v910_v62  ;;  %v1489_v62 = vpop.eup %1137  ;;  %v1544_v49 = vmul.f32 %v1475_v32, %v109_v18 }
  0x69   :  { %v1496_v6 = vpop.eup %1139  ;;  %v322_v25 = vadd.f32 1.0, %v1489_v62  ;;  %v325_v33 = vmul.f32 -0.5, %v1489_v62  ;;  %v328_v30 = vand.u32 2147483647, %v1489_v62 }
  0x6a   :  { %v1142_v14 = vpop.eup %1141  ;;  %v334_v2 = vmul.f32 -0.5, %v1496_v6 }
  0x6b   :  { %v1144_v21 = vpop.eup %1143  ;;  %v80_v36 = vmul.f32 0.6931472, %v1142_v14  ;;  %1159 = vlog2.f32 %v322_v25  ;;  %vm1610_vm2 = vcmp.lt.f32.partialorder %v328_v30, 0.0004427343 }
  0x6c   :  { %914 = vmax.xlane.f32.xlu1 %v913_v1  ;;  %v135_v1 = vsel %vm127_vm3, %v1134_v39, %v131_v51  ;;  %v1518_v26 = vpop.eup %1145  ;;  %v89_v37 = vmul.f32 0.6931472, %v1144_v21  ;;  %v331_v39 = vadd.f32 1.0, %v1496_v6  ;;  %1161 = vrcp.f32 %v322_v25 }
  0x6d   :  { %v139_v22 = vsub.f32 1.0, %v135_v1  ;;  %v1148_v35 = vpop.eup %1147  ;;  %vm364_vm3 = vcmp.ge.f32.partialorder %v1388_v31, 0.0 }
  0x6e   :  { %v1150_v48 = vpop.eup %1149  ;;  %v132_v56 = vsub.f32 1.0, %v1148_v35  ;;  %1163 = vrcp.f32 %v331_v39 }
  0x6f   :  { %v1152_v54 = vpop.eup %1151  ;;  %v133_v24 = vsub.f32 1.0, %v1150_v48 }
  0x70   :  { %v1154_v32 = vpop.eup %1153  ;;  %v98_v25 = vmul.f32 0.6931472, %v1152_v54 }
  0x71   :  { %v1574_v63 = vmul.f32 0.6931472, %v1154_v32  ;;  %v337_v32 = vand.u32 2147483647, %v1496_v6 }
  0x72   :  { %v104_v54 = vsel %vm1520_vm9, %v1507_v16, %v98_v25 }
  0x81   :  { %v1478_v45 = vpop.permute.xlu0 %35 }
  0x82   :  { %vm46_vm7 = vcmp.eq.s32.totalorder %v1304_v4, %v1478_v45 }
  0x83   :  { %v70_v41 = vsel %vm46_vm7, %v1302_v3, 0.0  ;;  %v142_v42 = vsel %vm46_vm7, %v134_v0, %v138_v11  ;;  %v326_v0 = vadd.f32 1.0, %v325_v33  ;;  %v86_v11 = vsel %vm1491_vm4, %v1486_v59, %v80_v36  ;;  %v1156_v33 = vpop.eup %1155 }
  0x84   :  { %v74_v13 = vsub.f32 %v66_v58, %v70_v41  ;;  %v146_v14 = vsub.f32 1.0, %v142_v42  ;;  %v1568_v58 = vmul.f32 %v1480_v52, %v317_v53  ;;  %v136_v41 = vsel %vm128_vm6, %v1148_v35, %v132_v56 }
  0x85   :  { %v1498_v7 = vpop.permute.xlu0 %38  ;;  %v335_v59 = vadd.f32 1.0, %v334_v2  ;;  %v303_v35 = vmax.f32 %v1376_v27, 0.0  ;;  %v140_v56 = vsub.f32 1.0, %v136_v41  ;;  %v1589_v2 = vmul.f32 0.6931472, %v1156_v33 }
  0x86   :  { %vm47_vm8 = vcmp.eq.s32.totalorder %v1304_v4, %v1498_v7  ;;  %v114_v9 = vadd.f32 %v86_v11, %v74_v13  ;;  %v150_v36 = vmul.f32 %v146_v14, %v146_v14  ;;  %v346_v11 = vand.u32 2147483647, %v1518_v26 }
  0x87   :  { %v71_v44 = vsel %vm47_vm8, %v1329_v12, 0.0  ;;  %v143_v47 = vsel %vm47_vm8, %v135_v1, %v139_v22  ;;  %v1556_v1 = vadd.f32 1.0, %v1518_v26  ;;  %v95_v22 = vsel %vm1502_vm5, %v1500_v8, %v89_v37  ;;  %v1158_v8 = vpop.eup %1157 }
  0x88   :  { %v75_v18 = vsub.f32 %v67_v61, %v71_v44  ;;  %v147_v20 = vsub.f32 1.0, %v143_v47  ;;  %v302_v61 = vmax.f32 %v1364_v23, 0.0  ;;  %v137_v44 = vsel %vm129_vm10, %v1150_v48, %v133_v24  ;;  %v1160_v53 = vpop.eup %1159 }
  0x89   :  { %1165 = vrcp.f32 %v1556_v1  ;;  %v1583_v47 = vmul.f32 %v1489_v62, %v326_v0  ;;  %v113_v48 = vsel %vm1546_vm11, %v1544_v49, %v1574_v63  ;;  %v365_v62 = vsub.f32 1.0, %v1158_v8 }
  0x8a   :  { %v115_v37 = vadd.f32 %v95_v22, %v75_v18  ;;  %v151_v42 = vmul.f32 %v147_v20, %v147_v20  ;;  %1167 = vlog2.f32 %v331_v39  ;;  %v1597_v0 = vmul.f32 %v1496_v6, %v335_v59  ;;  %v1162_v39 = vpop.eup %1161 }
  0x8b   :  { %v154_v13 = vmul.f32 %v150_v36, %v114_v9  ;;  %v141_v14 = vsub.f32 1.0, %v137_v44  ;;  %v343_v18 = vmul.f32 -0.5, %v1518_v26  ;;  %v2232_v20 = vmov 0.75   ;;  %v1164_v24 = vpop.eup %1163 }
  0x8c   :  { %v155_v28 = vmul.f32 %v151_v42, %v115_v37  ;;  %v158_v51 = vsel %vm46_vm7, 0.25, %v2232_v20  ;;  %v159_v6 = vsel %vm47_vm8, 0.25, %v2232_v20  ;;  %v321_v7 = vsel %vm1550_vm12, %v1568_v58, %v1589_v2 }
  0x8d   :  { %v369_v33 = vsel %vm361_vm13, %v1158_v8, %v365_v62  ;;  %v366_v63 = vsub.f32 1.0, %v1162_v39  ;;  %v162_v59 = vmul.f32 %v158_v51, %v154_v13  ;;  %1169 = vlog2.f32 %v1556_v1 }
  0x8e   :  { %v163_v9 = vmul.f32 %v159_v6, %v155_v28  ;;  %v344_v42 = vadd.f32 1.0, %v343_v18  ;;  %vm1636_vm5 = vcmp.lt.f32.partialorder %v337_v32, 0.0004427343  ;;  %vm1681_vm8 = vcmp.lt.f32.partialorder %v346_v11, 0.0004427343 }
  0x8f   :  { %v370_v28 = vsel %vm362_vm14, %v1162_v39, %v366_v63  ;;  %v167_v18 = vsel %vm166_vm0, %v162_v59, 0.0 }
  0x90   :  { %v168_v51 = vsel %vm166_vm0, %v163_v9, 0.0 }
  0x93   :  { %v1166_v37 = vpop.eup %1165 }
  0x94   :  { %v1558_v21 = vpop.xlane.xlu1 %191  ;;  %v1168_v1 = vpop.eup %1167 }
  0x95   :  { %vm202_vm12 = vcmp.ge.f32.partialorder %v1558_v21, %v1302_v3 }
  0x98   :  { %v1577_v52 = vpop.xlane.xlu1 %200 }
  0x9c   :  { %v42_v16 = vpop.permute.xlu1 %41 }
  0x9d   :  { %vm48_vm1 = vcmp.eq.s32.totalorder %v1304_v4, %v42_v16 }
  0x9e   :  { %v72_v22 = vsel %vm48_vm1, %v1340_v15, 0.0  ;;  %v144_v45 = vsel %vm48_vm1, %v136_v41, %v140_v56  ;;  %v324_v41 = vmul.f32 0.6931472, %v1160_v53  ;;  %v373_v56 = vsub.f32 1.0, %v369_v33 }
  0x9f   :  { %v76_v25 = vsub.f32 %v68_v10, %v72_v22  ;;  %v148_v30 = vsub.f32 1.0, %v144_v45  ;;  %v367_v53 = vsub.f32 1.0, %v1164_v24 }
  0xa0   :  { %v45_v36 = vpop.permute.xlu1 %44 }
  0xa1   :  { %v116_v57 = vadd.f32 %v104_v54, %v76_v25  ;;  %v152_v58 = vmul.f32 %v148_v30, %v148_v30  ;;  %vm49_vm4 = vcmp.eq.s32.totalorder %v1304_v4, %v45_v36  ;;  %v374_v25 = vsub.f32 1.0, %v370_v28 }
  0xa2   :  { %v73_v10 = vsel %vm49_vm4, %v1309_v5, 0.0  ;;  %v145_v8 = vsel %vm49_vm4, %v137_v44, %v141_v14  ;;  %v160_v44 = vsel %vm48_vm1, 0.25, %v2232_v20  ;;  %v368_v14 = vsub.f32 1.0, %v1166_v37 }
  0xa3   :  { %v156_v62 = vmul.f32 %v152_v58, %v116_v57  ;;  %v77_v54 = vsub.f32 %v69_v17, %v73_v10  ;;  %v149_v13 = vsub.f32 1.0, %v145_v8  ;;  %v371_v30 = vsel %vm363_vm15, %v1164_v24, %v367_v53 }
  0xa4   :  { %v271_v32 = vpop.permute.xlu1 %270  ;;  %v161_v9 = vsel %vm49_vm4, 0.25, %v2232_v20  ;;  %v330_v57 = vsel %vm1610_vm2, %v1583_v47, %v324_v41  ;;  %v333_v58 = vmul.f32 0.6931472, %v1168_v1  ;;  %v169_v10 = vadd.f32 %v168_v51, %v167_v18 }
  0xa5   :  { %v164_v6 = vmul.f32 %v160_v44, %v156_v62  ;;  %v117_v22 = vadd.f32 %v113_v48, %v77_v54  ;;  %v153_v45 = vmul.f32 %v149_v13, %v149_v13  ;;  %vm281_vm6 = vcmp.eq.s32.totalorder %v1304_v4, %v271_v32 }
  0xa6   :  { %v305_v17 = vsel %vm281_vm6, %v1352_v19, 0.0  ;;  %v377_v39 = vsel %vm281_vm6, %v369_v33, %v373_v56  ;;  %v375_v24 = vsub.f32 1.0, %v371_v30  ;;  %v1170_v56 = vpop.eup %1169  ;;  %vm205_vm1 = vcmp.ge.f32.partialorder %v1577_v52, %v1309_v5  ;;  %v1035_v52 = vld [vmem:[%s2229_s4 + $0x40] sm:$0xff] }
  0xa7   :  { %v157_v16 = vmul.f32 %v153_v45, %v117_v22  ;;  %v309_v63 = vsub.f32 %v301_v29, %v305_v17  ;;  %v381_v59 = vsub.f32 1.0, %v377_v39  ;;  %v170_v48 = vsel %vm166_vm0, %v164_v6, 0.0 }
  0xa8   :  { %v274_v33 = vpop.permute.xlu1 %273  ;;  %v372_v29 = vsel %vm364_vm3, %v1166_v37, %v368_v14  ;;  %v171_v47 = vadd.f32 %v170_v48, %v169_v10  ;;  %v304_v37 = vmax.f32 %v1388_v31, 0.0 }
  0xa9   :  { %v165_v8 = vmul.f32 %v161_v9, %v157_v16  ;;  %vm282_vm7 = vcmp.eq.s32.totalorder %v1304_v4, %v274_v33  ;;  %v349_v53 = vadd.f32 %v321_v7, %v309_v63  ;;  %v385_v41 = vmul.f32 %v381_v59, %v381_v59 }
  0xaa   :  { %v306_v36 = vsel %vm282_vm7, %v1364_v23, 0.0  ;;  %v378_v49 = vsel %vm282_vm7, %v370_v28, %v374_v25  ;;  %v345_v7 = vmul.f32 %v1518_v26, %v344_v42  ;;  %v342_v26 = vmul.f32 0.6931472, %v1170_v56 }
  0xab   :  { %v310_v1 = vsub.f32 %v302_v61, %v306_v36  ;;  %v382_v62 = vsub.f32 1.0, %v378_v49  ;;  %v172_v54 = vsel %vm166_vm0, %v165_v8, 0.0  ;;  %v339_v61 = vsel %vm1636_vm5, %v1597_v0, %v333_v58 }
  0xac   :  { %v277_v13 = vpop.permute.xlu1 %276  ;;  %v173_v18 = vadd.f32 %v172_v54, %v171_v47  ;;  %v376_v11 = vsub.f32 1.0, %v372_v29  ;;  %v389_v6 = vmul.f32 %v385_v41, %v349_v53  ;;  %v394_v0 = vsel %vm282_vm7, 0.25, %v2232_v20 }
  0xad   :  { %v350_v28 = vadd.f32 %v330_v57, %v310_v1  ;;  %v386_v44 = vmul.f32 %v382_v62, %v382_v62  ;;  %vm283_vm9 = vcmp.eq.s32.totalorder %v1304_v4, %v277_v13  ;;  %v348_v63 = vsel %vm1681_vm8, %v345_v7, %v342_v26 }
  0xae   :  { %v307_v14 = vsel %vm283_vm9, %v1376_v27, 0.0  ;;  %v379_v42 = vsel %vm283_vm9, %v371_v30, %v375_v24  ;;  %174 = vadd.xlane.f32.xlu0 %v173_v18  ;;  %v393_v30 = vsel %vm281_vm6, 0.25, %v2232_v20  ;;  %v395_v32 = vsel %vm283_vm9, 0.25, %v2232_v20 }
  0xaf   :  { %v390_v22 = vmul.f32 %v386_v44, %v350_v28  ;;  %v311_v45 = vsub.f32 %v303_v35, %v307_v14  ;;  %v383_v17 = vsub.f32 1.0, %v379_v42  ;;  %v397_v9 = vmul.f32 %v393_v30, %v389_v6  ;;  %v1037_v6 = vld [vmem:[%s2229_s4 + $0x50] sm:$0xff] }
  0xb0   :  { %v280_v2 = vpop.permute.xlu1 %279  ;;  %v1257_v7 = vmov 0.0  }
  0xb1   :  { %v398_v39 = vmul.f32 %v394_v0, %v390_v22  ;;  %v351_v25 = vadd.f32 %v339_v61, %v311_v45  ;;  %v387_v16 = vmul.f32 %v383_v17, %v383_v17  ;;  %vm284_vm10 = vcmp.eq.s32.totalorder %v1304_v4, %v280_v2  ;;  %v1045_v45 = vld [vmem:[%s2229_s4 + $0x70] sm:$0xff] }
  0xb2   :  { %v308_v35 = vsel %vm284_vm10, %v1388_v31, 0.0  ;;  %v380_v59 = vsel %vm284_vm10, %v372_v29, %v376_v11  ;;  %v195_v48 = vpop.xlane.xlu0 %194  ;;  %v401_v36 = vsel %vm166_vm0, %v397_v9, 0.0  ;;  %v396_v47 = vsel %vm284_vm10, 0.25, %v2232_v20 }
  0xb3   :  { %v391_v57 = vmul.f32 %v387_v16, %v351_v25  ;;  %v312_v33 = vsub.f32 %v304_v37, %v308_v35  ;;  %v384_v58 = vsub.f32 1.0, %v380_v59  ;;  %v402_v10 = vsel %vm166_vm0, %v398_v39, 0.0  ;;  %v1038_v39 = vld [vmem:[%s2229_s4 + $0x58] sm:$0xff] }
  0xb4   :  { %v403_v41 = vadd.f32 %v402_v10, %v401_v36  ;;  %vm203_vm11 = vcmp.ge.f32.partialorder %v195_v48, %v1329_v12  ;;  %v1023_v28 = vsel %vm202_vm12, 1.0, %v1257_v7  ;;  %v1026_v21 = vsel %vm205_vm1, 1.0, %v1257_v7 }
  0xb5   :  { %v399_v8 = vmul.f32 %v395_v32, %v391_v57  ;;  %v352_v24 = vadd.f32 %v348_v63, %v312_v33  ;;  %v388_v56 = vmul.f32 %v384_v58, %v384_v58  ;;  %v1024_v51 = vsel %vm203_vm11, 1.0, %v1257_v7  ;;  %v1046_v63 = vld [vmem:[%s2229_s4 + $0x78] sm:$0xff] }
  0xb6   :  { %v198_v53 = vpop.xlane.xlu0 %197  ;;  %v1083_v12 = vpack.i.bf16 %v1024_v51, %v1023_v28  ;;  %v527_v36 = vand.u32 2147483647, %v1415_v40  ;;  %vm222_vm12 = vcmask 7168   ;;  %vm839_vm1 = vcmp.ge.f32.partialorder %v1397_v34, 0.0 }
  0xb7   :  { %v392_v49 = vmul.f32 %v388_v56, %v352_v24  ;;  %v404_v29 = vsel %vm166_vm0, %v399_v8, 0.0  ;;  %vm204_vm15 = vcmp.ge.f32.partialorder %v198_v53, %v1340_v15 }
  0xb8   :  { %v405_v62 = vadd.f32 %v404_v29, %v403_v41  ;;  %v526_v29 = vand.u32 2147483647, %v1407_v38 }
  0xb9   :  { %v400_v1 = vmul.f32 %v396_v47, %v392_v49  ;;  %v531_v49 = vsub.f32 0.0, %v527_v36 }
  0xba   :  { %v428_v54 = vpop.xlane.xlu0 %427  ;;  %v530_v41 = vsub.f32 0.0, %v526_v29 }
  0xbb   :  { %v406_v13 = vsel %vm166_vm0, %v400_v1, 0.0  ;;  %vm438_vm13 = vcmp.ge.f32.partialorder %v428_v54, %v1352_v19  ;;  %v1036_v19 = vld [vmem:[%s2229_s4 + $0x48] sm:$0xff]  ;;  %v536_v47 = vmul.f32 1.442695, %v531_v49  ;;  %v763_v1 = vand.u32 2147483647, %v1397_v34 }
  0xbc   :  { %v407_v18 = vadd.f32 %v406_v13, %v405_v62  ;;  %v1031_v44 = vsel %vm438_vm13, 1.0, %v1257_v7  ;;  %v764_v62 = vand.u32 2147483647, %v1443_v50  ;;  %v534_v54 = vmul.f32 1.442695, %v530_v41 }
  0xbd   :  { %1171 = vpow2.f32 %v536_v47  ;;  %v767_v13 = vsub.f32 0.0, %v763_v1  ;;  %vm603_vm13 = vcmp.ge.f32.partialorder %v1415_v40, 0.0 }
  0xbe   :  { %408 = vadd.xlane.f32.xlu1 %v407_v18  ;;  %v431_v37 = vpop.xlane.xlu0 %430  ;;  %v528_v18 = vand.u32 2147483647, %v1424_v43  ;;  %1173 = vpow2.f32 %v534_v54 }
  0xbf   :  { %vm439_vm14 = vcmp.ge.f32.partialorder %v431_v37, %v1364_v23  ;;  %v1025_v23 = vsel %vm204_vm15, 1.0, %v1257_v7  ;;  %v768_v37 = vsub.f32 0.0, %v764_v62  ;;  %vm602_vm15 = vcmp.ge.f32.partialorder %v1407_v38, 0.0 }
  0xc0   :  { %v1032_v61 = vsel %vm439_vm14, 1.0, %v1257_v7  ;;  %v1088_v15 = vpack.i.bf16 %v1026_v21, %v1025_v23  ;;  %v532_v51 = vsub.f32 0.0, %v528_v18 }
  0xc1   :  { %v1093_v42 = vpack.i.bf16 %v1032_v61, %v1031_v44  ;;  %v773_v28 = vmul.f32 1.442695, %v768_v37  ;;  %v765_v61 = vand.u32 2147483647, %v1453_v55 }
  0xc2   :  { %v434_v14 = vpop.xlane.xlu0 %433 }
  0xc3   :  { %vm440_vm2 = vcmp.ge.f32.partialorder %v434_v14, %v1376_v27  ;;  %v1043_v27 = vld [vmem:[%s2229_s4 + $0x60] sm:$0xff]  ;;  %v538_v14 = vmul.f32 1.442695, %v532_v51 }
  0xc4   :  { %1084 = vrot.lane.b32.xlu0 %v1083_v12, %s1258_s18  ;;  %v1033_v26 = vsel %vm440_vm2, 1.0, %v1257_v7  ;;  %v529_v12 = vand.u32 2147483647, %v1433_v46 }
  0xc6   :  { %v437_v3 = vpop.xlane.xlu0 %436 }
  0xc7   :  { %vm441_vm3 = vcmp.ge.f32.partialorder %v437_v3, %v1388_v31  ;;  %v1044_v31 = vld [vmem:[%s2229_s4 + $0x68] sm:$0xff]  ;;  %v1791_v44 = vpop.eup %1171  ;;  %v769_v3 = vsub.f32 0.0, %v765_v61  ;;  %s991_s4 = sshll.u32 %s2231_s6, 4  ;;  %s992_s4 = int_to_ptr.vmem [resolvable:$true] %s991_s4 }
  0xc8   :  { %1094 = vrot.lane.b32.xlu0 %v1093_v42, %s1258_s18  ;;  %v1034_v11 = vsel %vm441_vm3, 1.0, %v1257_v7  ;;  %v563_v42 = vadd.f32 1.0, %v1791_v44  ;;  %v1797_v23 = vpop.eup %1173  ;;  %vm840_vm3 = vcmp.ge.f32.partialorder %v1443_v50, 0.0 }
  0xc9   :  { %v1098_v5 = vpack.i.bf16 %v1034_v11, %v1033_v26  ;;  %v775_v21 = vmul.f32 1.442695, %v769_v3  ;;  %v557_v1 = vmul.f32 -0.5, %v1797_v23 }
  0xca   :  { %v906_v30 = vpop.xlane.xlu0 %905 }
  0xcb   :  { %vm916_vm8 = vcmp.ge.f32.partialorder %v906_v30, %v1397_v34 }
  0xcc   :  { %514 = vperm.xlu0 %1081, %v1036_v19   ;;  %v1047_v33 = vsel %vm916_vm8, 1.0, %v1257_v7  ;;  %v533_v19 = vsub.f32 0.0, %v529_v12  ;;  %v560_v12 = vand.u32 2147483647, %v1797_v23 }
  0xce   :  { %vm1855_vm2 = vcmp.lt.f32.partialorder %v560_v12, 0.0004427343 }
  0xcf   :  { %1089 = vrot.lane.b32.xlu1 %v1088_v15, %s1258_s18  ;;  %v540_v15 = vmul.f32 1.442695, %v533_v19  ;;  %v558_v19 = vadd.f32 1.0, %v557_v1 }
  0xd3   :  { %1099 = vrot.lane.b32.xlu1 %v1098_v5, %s1258_s18 }
  0xd7   :  { %511 = vperm.xlu1 %1082, %v1035_v52  }
  0xdb   :  { %748 = vperm.xlu1 %1082, %v1043_v27  }
  0xdf   :  { %751 = vperm.xlu1 %1082, %v1044_v31  }
  0xe1   :  { %v669_v22 = vpop.xlane.xlu1 %668 }
  0xe2   :  { %vm679_vm4 = vcmp.ge.f32.partialorder %v669_v22, %v1407_v38 }
  0xe3   :  { %517 = vperm.xlu1 %1082, %v1037_v6   ;;  %v1039_v17 = vsel %vm679_vm4, 1.0, %v1257_v7 }
  0xe5   :  { %v672_v0 = vpop.xlane.xlu1 %671 }
  0xe6   :  { %vm680_vm5 = vcmp.ge.f32.partialorder %v672_v0, %v1415_v40 }
  0xe7   :  { %754 = vperm.xlu1 %1082, %v1045_v45   ;;  %v1040_v2 = vsel %vm680_vm5, 1.0, %v1257_v7  ;;  %v566_v45 = vmul.f32 -0.5, %v1791_v44 }
  0xe8   :  { %v1103_v25 = vpack.i.bf16 %v1040_v2, %v1039_v17 }
  0xe9   :  { %v675_v16 = vpop.xlane.xlu1 %674 }
  0xea   :  { %vm681_vm6 = vcmp.ge.f32.partialorder %v675_v16, %v1424_v43  ;;  %1104 = vrot.lane.b32.xlu0 %v1103_v25, %s1258_s18  ;;  %v766_v43 = vand.u32 2147483647, %v1462_v60 }
  0xeb   :  { %520 = vperm.xlu1 %1082, %v1038_v39   ;;  %v1041_v35 = vsel %vm681_vm6, 1.0, %v1257_v7 }
  0xec   :  { %v770_v26 = vsub.f32 0.0, %v766_v43 }
  0xed   :  { %v678_v59 = vpop.xlane.xlu1 %677 }
  0xee   :  { %vm682_vm7 = vcmp.ge.f32.partialorder %v678_v59, %v1433_v46  ;;  %v777_v5 = vmul.f32 1.442695, %v770_v26  ;;  %v567_v59 = vadd.f32 1.0, %v566_v45 }
  0xef   :  { %757 = vperm.xlu1 %1082, %v1046_v63   ;;  %v1042_v48 = vsel %vm682_vm7, 1.0, %v1257_v7 }
  0xf0   :  { %v1108_v9 = vpack.i.bf16 %v1042_v48, %v1041_v35  ;;  %v569_v48 = vand.u32 2147483647, %v1791_v44  ;;  %v1826_v47 = vmul.f32 %v1791_v44, %v567_v59 }
  0xf1   :  { %v909_v57 = vpop.xlane.xlu1 %908 }
  0xf2   :  { %vm917_vm9 = vcmp.ge.f32.partialorder %v909_v57, %v1443_v50  ;;  %vm1828_vm14 = vcmp.lt.f32.partialorder %v569_v48, 0.0004427343 }
  0xf3   :  { %v1048_v58 = vsel %vm917_vm9, 1.0, %v1257_v7  ;;  %1109 = vrot.lane.b32.xlu1 %v1108_v9, %s1258_s18 }
  0xf4   :  { %v1113_v32 = vpack.i.bf16 %v1048_v58, %v1047_v33 }
  0xf5   :  { %v912_v10 = vpop.xlane.xlu1 %911 }
  0xf6   :  { %vm918_vm10 = vcmp.ge.f32.partialorder %v912_v10, %v1453_v55  ;;  %1114 = vrot.lane.b32.xlu0 %v1113_v32, %s1258_s18  ;;  %v554_v55 = vadd.f32 1.0, %v1797_v23 }
  0xf7   :  { %v1049_v8 = vsel %vm918_vm10, 1.0, %v1257_v7 }
  0xf9   :  { %v915_v24 = vpop.xlane.xlu1 %914 }
  0xfa   :  { %vm919_vm11 = vcmp.ge.f32.partialorder %v915_v24, %v1462_v60 }
  0xfb   :  { %v1050_v56 = vsel %vm919_vm11, 1.0, %v1257_v7  ;;  %v771_v7 = vmul.f32 1.442695, %v767_v13 }
  0xfc   :  { %v1118_v53 = vpack.i.bf16 %v1050_v56, %v1049_v8 }
  0xfd   :  { %1175 = vpow2.f32 %v771_v7 }
  0xfe   :  { %1119 = vrot.lane.b32.xlu1 %v1118_v53, %s1258_s18  ;;  %1177 = vpow2.f32 %v773_v28 }
  0xff   :  { %1179 = vpow2.f32 %v538_v14 }
 0x100   :  { %1181 = vrcp.f32 %v563_v42 }
 0x101   :  { %1183 = vlog2.f32 %v563_v42  ;;  %v543_v42 = vmax.f32 %v1415_v40, 0.0 }
 0x102   :  { %1185 = vpow2.f32 %v775_v21 }
 0x103   :  { %1187 = vpow2.f32 %v540_v15 }
 0x104   :  { %1189 = vrcp.f32 %v554_v55 }
 0x105   :  { %1191 = vpow2.f32 %v777_v5 }
 0x107   :  { %v1800_v11 = vpop.eup %1175 }
 0x108   :  { %v1802_v46 = vpop.eup %1177  ;;  %v791_v60 = vadd.f32 1.0, %v1800_v11  ;;  %v794_v44 = vmul.f32 -0.5, %v1800_v11 }
 0x109   :  { %v800_v52 = vadd.f32 1.0, %v1802_v46  ;;  %v1806_v27 = vpop.eup %1179  ;;  %v803_v14 = vmul.f32 -0.5, %v1802_v46 }
 0x10a   :  { %v1182_v6 = vpop.eup %1181  ;;  %1193 = vrcp.f32 %v791_v60  ;;  %v572_v39 = vadd.f32 1.0, %v1806_v27  ;;  %v578_v1 = vand.u32 2147483647, %v1806_v27 }
 0x10b   :  { %1195 = vrcp.f32 %v800_v52  ;;  %v607_v2 = vsub.f32 1.0, %v1182_v6  ;;  %v1184_v25 = vpop.eup %1183 }
 0x10c   :  { %1197 = vlog2.f32 %v554_v55  ;;  %v1811_v35 = vpop.eup %1185  ;;  %v1818_v24 = vmul.f32 0.6931472, %v1184_v25  ;;  %v806_v25 = vand.u32 2147483647, %v1802_v46  ;;  %vm1945_vm7 = vcmp.lt.f32.partialorder %v578_v1, 0.0004427343 }
 0x10d   :  { %1199 = vlog2.f32 %v791_v60  ;;  %v1814_v9 = vpop.eup %1187  ;;  %v1822_v56 = vsel %vm603_vm13, %v1182_v6, %v607_v2  ;;  %v809_v29 = vadd.f32 1.0, %v1811_v35  ;;  %v795_v60 = vadd.f32 1.0, %v794_v44 }
 0x10e   :  { %1201 = vlog2.f32 %v800_v52  ;;  %v1190_v32 = vpop.eup %1189  ;;  %v581_v62 = vadd.f32 1.0, %v1814_v9  ;;  %v615_v3 = vsub.f32 1.0, %v1822_v56  ;;  %v571_v21 = vsel %vm1828_vm14, %v1826_v47, %v1818_v24 }
 0x10f   :  { %1203 = vrcp.f32 %v572_v39  ;;  %v1834_v54 = vpop.eup %1191  ;;  %v606_v7 = vsub.f32 1.0, %v1190_v32  ;;  %v797_v52 = vand.u32 2147483647, %v1800_v11  ;;  %vm1896_vm5 = vcmp.lt.f32.partialorder %v806_v25, 0.0004427343  ;;  %v1952_v25 = vld [vmem:[%s2228_s3 + $0x10] sm:$0xff] }
 0x110   :  { %1205 = vlog2.f32 %v572_v39  ;;  %v1863_v39 = vmul.f32 %v1797_v23, %v558_v19  ;;  %v818_v59 = vadd.f32 1.0, %v1834_v54  ;;  %v1878_v23 = vmul.f32 %v1800_v11, %v795_v60 }
 0x111   :  { %1207 = vrcp.f32 %v809_v29  ;;  %v1848_v15 = vsel %vm602_vm15, %v1190_v32, %v606_v7  ;;  %vm1880_vm4 = vcmp.lt.f32.partialorder %v797_v52, 0.0004427343  ;;  %vm841_vm8 = vcmp.ge.f32.partialorder %v1952_v25, 0.0 }
 0x112   :  { %1209 = vrcp.f32 %v581_v62 }
 0x113   :  { %1211 = vlog2.f32 %v809_v29 }
 0x114   :  { %v1194_v51 = vpop.eup %1193  ;;  %1213 = vlog2.f32 %v581_v62  ;;  %v584_v62 = vmul.f32 -0.5, %v1814_v9 }
 0x115   :  { %v1196_v61 = vpop.eup %1195  ;;  %v843_v26 = vsub.f32 1.0, %v1194_v51  ;;  %1215 = vrcp.f32 %v818_v59 }
 0x116   :  { %v1198_v43 = vpop.eup %1197  ;;  %1217 = vlog2.f32 %v818_v59 }
 0x117   :  { %v1200_v55 = vpop.eup %1199  ;;  %v1860_v2 = vmul.f32 0.6931472, %v1198_v43 }
 0x118   :  { %v1202_v6 = vpop.eup %1201  ;;  %v1875_v48 = vmul.f32 0.6931472, %v1200_v55 }
 0x119   :  { %v562_v11 = vsel %vm1855_vm2, %v1863_v39, %v1860_v2 }
 0x13b   :  { %v175_v31 = vpop.xlane.xlu0 %174 }
 0x13c   :  { %v176_v22 = vrot.slane %v175_v31, 4 }
 0x13e   :  { %v177_v17 = vadd.f32 %v176_v22, %v175_v31  ;;  %v844_v31 = vsub.f32 1.0, %v1196_v61  ;;  %v542_v22 = vmax.f32 %v1407_v38, 0.0 }
 0x13f   :  { %v1085_v0 = vpop.permute.xlu0 %1084 }
 0x140   :  { %v178_v16 = vrot.slane %v177_v17, 2  ;;  %v1087_v30 = vunpack.i.h.bf16 %v1085_v0  ;;  %v1086_v63 = vunpack.i.l.bf16 %v1085_v0  ;;  %v1204_v0 = vpop.eup %1203 }
 0x141   :  { %v608_v32 = vsub.f32 1.0, %v1204_v0 }
 0x142   :  { %v223_v57 = vsel %vm222_vm12, %v1086_v63, 0.0  ;;  %v224_v33 = vsel %vm222_vm12, %v1087_v30, 0.0  ;;  %v179_v58 = vadd.f32 %v178_v16, %v177_v17  ;;  %v804_v17 = vadd.f32 1.0, %v803_v14 }
 0x143   :  { %v1095_v10 = vpop.permute.xlu0 %1094  ;;  %v225_v8 = vadd.f32 %v224_v33, %v223_v57  ;;  %v575_v16 = vmul.f32 -0.5, %v1806_v27  ;;  %v614_v30 = vsub.f32 1.0, %v1848_v15  ;;  %v1870_v63 = vsel %vm839_vm1, %v1194_v51, %v843_v26 }
 0x144   :  { %v1097_v53 = vunpack.i.h.bf16 %v1095_v10  ;;  %v1096_v36 = vunpack.i.l.bf16 %v1095_v10  ;;  %v180_v49 = vrot.slane %v179_v58, 1  ;;  %v1884_v33 = vsel %vm840_vm3, %v1196_v61, %v844_v31 }
 0x145   :  { %226 = vadd.xlane.f32.xlu1 %v225_v8  ;;  %v1889_v34 = vmul.f32 %v1802_v46, %v804_v17  ;;  %v812_v10 = vmul.f32 -0.5, %v1811_v35  ;;  %v1206_v8 = vpop.eup %1205  ;;  %v851_v29 = vsub.f32 1.0, %v1870_v63  ;;  %v852_v61 = vsub.f32 1.0, %v1884_v33 }
 0x146   :  { %v181_v13 = vadd.f32 %v180_v49, %v179_v58  ;;  %v458_v18 = vsel %vm222_vm12, %v1096_v36, 0.0  ;;  %v459_v37 = vsel %vm222_vm12, %v1097_v53, 0.0  ;;  %v1886_v58 = vmul.f32 0.6931472, %v1202_v6  ;;  %v1903_v49 = vld [vmem:[%s2227_s2 + $0x10] sm:$0xff]  ;;  %v1208_v46 = vpop.eup %1207 }
 0x147   :  { %v460_v28 = vadd.f32 %v459_v37, %v458_v18  ;;  %v576_v36 = vadd.f32 1.0, %v575_v16  ;;  %vm604_vm6 = vcmp.ge.f32.partialorder %v1903_v49, 0.0  ;;  %v1914_v37 = vld [vmem:[%s2228_s3] sm:$0xff]  ;;  %v813_v26 = vadd.f32 1.0, %v812_v10  ;;  %v1963_v10 = vld [vmem:[%s2227_s2 + $0x18] sm:$0xff] }
 0x148   :  { %1051 = vpush %v181_v13  ;;  %v1210_v13 = vpop.eup %1209  ;;  %v1937_v43 = vsel %vm604_vm6, %v1204_v0, %v608_v32  ;;  %v1939_v60 = vmul.f32 0.6931472, %v1206_v8  ;;  %v815_v31 = vand.u32 2147483647, %v1811_v35  ;;  %v845_v6 = vsub.f32 1.0, %v1208_v46 }
 0x149   :  { %461 = vadd.xlane.f32.xlu1 %v460_v28  ;;  %v1924_v28 = vld [vmem:[%s2228_s3 + $0x8] sm:$0xff]  ;;  %v1212_v55 = vpop.eup %1211  ;;  %v1942_v52 = vmul.f32 %v1806_v27, %v576_v36  ;;  %v585_v0 = vadd.f32 1.0, %v584_v62  ;;  %v609_v16 = vsub.f32 1.0, %v1210_v13  ;;  %vm605_vm10 = vcmp.ge.f32.partialorder %v1963_v10, 0.0 }
 0x14a   :  { %v1214_v8 = vpop.eup %1213  ;;  %v1968_v36 = vmul.f32 0.6931472, %v1212_v55  ;;  %v1971_v1 = vmul.f32 %v1811_v35, %v813_v26  ;;  %v587_v62 = vand.u32 2147483647, %v1814_v9  ;;  %vm1979_vm13 = vcmp.lt.f32.partialorder %v815_v31, 0.0004427343 }
 0x14b   :  { %v1851_v5 = vpop.xlane.xlu1 %408  ;;  %v1928_v12 = vpop.permute.xlu0 %514  ;;  %v1985_v55 = vsel %vm841_vm8, %v1208_v46, %v845_v6  ;;  %v1224_v35 = vld [vmem:[%s2227_s2 + $0x8] sm:$0xff]  ;;  %v1994_v20 = vmul.f32 %v1814_v9, %v585_v0  ;;  %v1996_v14 = vsel %vm605_vm10, %v1210_v13, %v609_v16  ;;  %v821_v31 = vmul.f32 -0.5, %v1834_v54  ;;  %v1225_v6 = vld [vmem:[%s2227_s2] sm:$0xff] }
 0x14c   :  { %2256 = vst [vmem:[#allocation8_spill] sm:$0xff] %v1851_v5  ;;  %vm523_vm9 = vcmp.eq.s32.totalorder %v1304_v4, %v1928_v12  ;;  %v2019_v16 = vmul.f32 0.6931472, %v1214_v8  ;;  %vm2027_vm15 = vcmp.lt.f32.partialorder %v587_v62, 0.0004427343  ;;  %v2047_v62 = vld [vmem:[%s2228_s3 + $0x18] sm:$0xff] }
 0x14d   :  { %v547_v26 = vsel %vm523_vm9, %v1224_v35, 0.0  ;;  %v619_v46 = vsel %vm523_vm9, %v1822_v56, %v615_v3  ;;  %v1216_v56 = vpop.eup %1215  ;;  %v853_v35 = vsub.f32 1.0, %v1985_v55  ;;  %vm842_vm3 = vcmp.ge.f32.partialorder %v2047_v62, 0.0 }
 0x14e   :  { %2269 = vst [vmem:[#allocation11_spill] sm:$0xff] %v2019_v16  ;;  %v623_v32 = vsub.f32 1.0, %v619_v46  ;;  %v1218_v46 = vpop.eup %1217  ;;  %v782_v24 = vmax.f32 %v2047_v62, 0.0  ;;  %v2274_v45 = vsub.f32 1.0, %v1937_v43 }
 0x14f   :  { %v1873_v50 = vpop.permute.xlu1 %1089  ;;  %v2102_v39 = vmul.f32 0.6931472, %v1218_v46 }
 0x150   :  { %2259 = vst [vmem:[#allocation9_spill] sm:$0xff] %v1873_v50 }
 0x153   :  { %v1909_v18 = vpop.permute.xlu1 %1099 }
 0x154   :  { %2264 = vst [vmem:[#allocation10_spill] sm:$0xff] %v1909_v18 }
 0x157   :  { %v1957_v27 = vpop.permute.xlu1 %511 }
 0x158   :  { %vm522_vm11 = vcmp.eq.s32.totalorder %v1304_v4, %v1957_v27  ;;  %v2283_v27 = vsel %vm1979_vm13, %v1971_v1, %v1968_v36 }
 0x159   :  { %v546_v9 = vsel %vm522_vm11, %v1225_v6, 0.0  ;;  %v618_v13 = vsel %vm522_vm11, %v1848_v15, %v614_v30  ;;  %v551_v15 = vsub.f32 %v543_v42, %v547_v26  ;;  %v822_v42 = vadd.f32 1.0, %v821_v31 }
 0x15a   :  { %v550_v3 = vsub.f32 %v542_v22, %v546_v9  ;;  %v622_v44 = vsub.f32 1.0, %v618_v13  ;;  %v846_v26 = vsub.f32 1.0, %v1216_v56 }
 0x15b   :  { %v2017_v0 = vpop.permute.xlu1 %748  ;;  %v2092_v47 = vmul.f32 %v1834_v54, %v822_v42 }
 0x15c   :  { %v1105_v6 = vpop.permute.xlu0 %1104  ;;  %vm759_vm1 = vcmp.eq.s32.totalorder %v1304_v4, %v2017_v0  ;;  %v590_v40 = vadd.f32 %v562_v11, %v550_v3  ;;  %v626_v8 = vmul.f32 %v622_v44, %v622_v44  ;;  %v850_v11 = vsel %vm842_vm3, %v1216_v56, %v846_v26  ;;  %v2286_v0 = vld [vmem:[#allocation11_spill] sm:$0xff] }
 0x15d   :  { %v1107_v30 = vunpack.i.h.bf16 %v1105_v6  ;;  %v1106_v7 = vunpack.i.l.bf16 %v1105_v6  ;;  %v783_v38 = vsel %vm759_vm1, %v1914_v37, 0.0  ;;  %v855_v22 = vsel %vm759_vm1, %v1870_v63, %v851_v29 }
 0x15e   :  { %v824_v63 = vand.u32 2147483647, %v1834_v54  ;;  %v591_v6 = vadd.f32 %v571_v21, %v551_v15  ;;  %v859_v5 = vsub.f32 1.0, %v855_v22  ;;  %v2275_v54 = vmax.f32 %v1903_v49, 0.0 }
 0x15f   :  { %v2038_v51 = vpop.permute.xlu1 %751  ;;  %v700_v31 = vsel %vm222_vm12, %v1107_v30, 0.0  ;;  %v699_v29 = vsel %vm222_vm12, %v1106_v7, 0.0  ;;  %v627_v30 = vmul.f32 %v623_v32, %v623_v32  ;;  %v2273_v7 = vmax.f32 %v1924_v28, 0.0 }
 0x160   :  { %vm760_vm6 = vcmp.eq.s32.totalorder %v1304_v4, %v2038_v51  ;;  %v701_v50 = vadd.f32 %v700_v31, %v699_v29  ;;  %vm2108_vm2 = vcmp.lt.f32.partialorder %v824_v63, 0.0004427343  ;;  %v630_v3 = vmul.f32 %v626_v8, %v590_v40 }
 0x161   :  { %v784_v9 = vsel %vm760_vm6, %v1924_v28, 0.0  ;;  %v856_v13 = vsel %vm760_vm6, %v1884_v33, %v852_v61  ;;  %v2272_v33 = vmax.f32 %v1914_v37, 0.0  ;;  %v631_v37 = vmul.f32 %v627_v30, %v591_v6 }
 0x162   :  { %v788_v18 = vsub.f32 %v2273_v7, %v784_v9  ;;  %v860_v16 = vsub.f32 1.0, %v856_v13  ;;  %702 = vadd.xlane.f32.xlu1 %v701_v50  ;;  %v863_v42 = vmul.f32 %v859_v5, %v859_v5  ;;  %v2279_v50 = vsel %vm1896_vm5, %v1889_v34, %v1886_v58 }
 0x163   :  { %v787_v61 = vsub.f32 %v2272_v33, %v783_v38  ;;  %v518_v41 = vpop.permute.xlu1 %517  ;;  %v2280_v8 = vsel %vm1945_vm7, %v1942_v52, %v1939_v60  ;;  %v854_v34 = vsub.f32 1.0, %v850_v11  ;;  %v2282_v60 = vmax.f32 %v1952_v25, 0.0 }
 0x164   :  { %vm524_vm14 = vcmp.eq.s32.totalorder %v1304_v4, %v518_v41  ;;  %v864_v26 = vmul.f32 %v860_v16, %v860_v16  ;;  %v2284_v13 = vsub.f32 1.0, %v1996_v14  ;;  %v826_v36 = vsel %vm2108_vm2, %v2092_v47, %v2102_v39 }
 0x165   :  { %v548_v21 = vsel %vm524_vm14, %v1903_v49, 0.0  ;;  %v620_v2 = vsel %vm524_vm14, %v1937_v43, %v2274_v45  ;;  %v2278_v43 = vsel %vm1880_vm4, %v1878_v23, %v1875_v48  ;;  %v828_v49 = vadd.f32 %v2279_v50, %v788_v18 }
 0x166   :  { %v552_v28 = vsub.f32 %v2275_v54, %v548_v21  ;;  %v624_v44 = vsub.f32 1.0, %v620_v2  ;;  %v827_v15 = vadd.f32 %v2278_v43, %v787_v61  ;;  %v2281_v48 = vmov 0.75  }
 0x167   :  { %v755_v56 = vpop.permute.xlu1 %754  ;;  %v635_v5 = vsel %vm523_vm9, 0.25, %v2281_v48  ;;  %v634_v53 = vsel %vm522_vm11, 0.25, %v2281_v48  ;;  %v636_v22 = vsel %vm524_vm14, 0.25, %v2281_v48  ;;  %v871_v1 = vsel %vm759_vm1, 0.25, %v2281_v48 }
 0x168   :  { %v592_v40 = vadd.f32 %v2280_v8, %v552_v28  ;;  %v628_v57 = vmul.f32 %v624_v44, %v624_v44  ;;  %vm761_vm8 = vcmp.eq.s32.totalorder %v1304_v4, %v755_v56  ;;  %v639_v17 = vmul.f32 %v635_v5, %v631_v37 }
 0x169   :  { %v785_v23 = vsel %vm761_vm8, %v1952_v25, 0.0  ;;  %v857_v58 = vsel %vm761_vm8, %v1985_v55, %v853_v35  ;;  %v638_v16 = vmul.f32 %v634_v53, %v630_v3  ;;  %v867_v38 = vmul.f32 %v863_v42, %v827_v15 }
 0x16a   :  { %v632_v18 = vmul.f32 %v628_v57, %v592_v40  ;;  %v789_v52 = vsub.f32 %v2282_v60, %v785_v23  ;;  %v861_v12 = vsub.f32 1.0, %v857_v58  ;;  %v868_v55 = vmul.f32 %v864_v26, %v828_v49  ;;  %v2288_v26 = vld [vmem:[#allocation9_spill] sm:$0xff] }
 0x16b   :  { %v521_v31 = vpop.permute.xlu1 %520  ;;  %v2285_v29 = vmax.f32 %v1963_v10, 0.0  ;;  %v643_v33 = vsel %vm166_vm0, %v639_v17, 0.0  ;;  %v642_v61 = vsel %vm166_vm0, %v638_v16, 0.0  ;;  %v872_v7 = vsel %vm760_vm6, 0.25, %v2281_v48  ;;  %v2289_v16 = vld [vmem:[#allocation10_spill] sm:$0xff] }
 0x16c   :  { %v829_v35 = vadd.f32 %v2283_v27, %v789_v52  ;;  %v865_v46 = vmul.f32 %v861_v12, %v861_v12  ;;  %vm525_vm4 = vcmp.eq.s32.totalorder %v1304_v4, %v521_v31  ;;  %v640_v25 = vmul.f32 %v636_v22, %v632_v18 }
 0x16d   :  { %v549_v9 = vsel %vm525_vm4, %v1963_v10, 0.0  ;;  %v621_v63 = vsel %vm525_vm4, %v1996_v14, %v2284_v13  ;;  %v875_v14 = vmul.f32 %v871_v1, %v867_v38  ;;  %v876_v47 = vmul.f32 %v872_v7, %v868_v55  ;;  %v1115_v13 = vpop.permute.xlu0 %1114 }
 0x16e   :  { %v869_v59 = vmul.f32 %v865_v46, %v829_v35  ;;  %v553_v6 = vsub.f32 %v2285_v29, %v549_v9  ;;  %v625_v30 = vsub.f32 1.0, %v621_v63  ;;  %v2287_v21 = vsel %vm2027_vm15, %v1994_v20, %v2286_v0 }
 0x16f   :  { %v758_v41 = vpop.permute.xlu1 %757  ;;  %v873_v2 = vsel %vm761_vm8, 0.25, %v2281_v48  ;;  %v645_v19 = vsel %vm166_vm0, %v640_v25, 0.0  ;;  %v637_v44 = vsel %vm525_vm4, 0.25, %v2281_v48  ;;  %v644_v3 = vadd.f32 %v643_v33, %v642_v61 }
 0x170   :  { %v593_v10 = vadd.f32 %v2287_v21, %v553_v6  ;;  %v629_v45 = vmul.f32 %v625_v30, %v625_v30  ;;  %vm762_vm5 = vcmp.eq.s32.totalorder %v1304_v4, %v758_v41  ;;  %v877_v37 = vmul.f32 %v873_v2, %v869_v59  ;;  %v2290_v2 = vld [vmem:[#allocation8_spill] sm:$0xff] }
 0x171   :  { %v786_v51 = vsel %vm762_vm5, %v2047_v62, 0.0  ;;  %v858_v39 = vsel %vm762_vm5, %v850_v11, %v854_v34  ;;  %v880_v43 = vsel %vm166_vm0, %v876_v47, 0.0  ;;  %v646_v50 = vadd.f32 %v645_v19, %v644_v3 }
 0x172   :  { %v633_v54 = vmul.f32 %v629_v45, %v593_v10  ;;  %v790_v20 = vsub.f32 %v782_v24, %v786_v51  ;;  %v862_v28 = vsub.f32 1.0, %v858_v39  ;;  %v879_v11 = vsel %vm166_vm0, %v875_v14, 0.0 }
 0x173   :  { %v1110_v32 = vpop.permute.xlu1 %1109  ;;  %v882_v24 = vsel %vm166_vm0, %v877_v37, 0.0  ;;  %v1092_v8 = vunpack.i.h.bf16 %v2288_v26  ;;  %v874_v40 = vsel %vm762_vm5, 0.25, %v2281_v48  ;;  %v881_v23 = vadd.f32 %v880_v43, %v879_v11 }
 0x174   :  { %v641_v15 = vmul.f32 %v637_v44, %v633_v54  ;;  %v830_v42 = vadd.f32 %v826_v36, %v790_v20  ;;  %v866_v62 = vmul.f32 %v862_v28, %v862_v28  ;;  %v1091_v58 = vunpack.i.l.bf16 %v2288_v26 }
 0x175   :  { %v883_v60 = vadd.f32 %v882_v24, %v881_v23  ;;  %v1102_v38 = vunpack.i.h.bf16 %v2289_v16  ;;  %v1101_v22 = vunpack.i.l.bf16 %v2289_v16  ;;  %v246_v55 = vsel %vm222_vm12, %v1092_v8, 0.0 }
 0x176   :  { %v870_v49 = vmul.f32 %v866_v62, %v830_v42  ;;  %v647_v56 = vsel %vm166_vm0, %v641_v15, 0.0  ;;  %v245_v31 = vsel %vm222_vm12, %v1091_v58, 0.0  ;;  %v1112_v35 = vunpack.i.h.bf16 %v1110_v32 }
 0x177   :  { %v648_v57 = vadd.f32 %v647_v56, %v646_v50  ;;  %v1120_v5 = vpop.permute.xlu1 %1119  ;;  %v247_v27 = vadd.f32 %v246_v55, %v245_v31  ;;  %v1111_v46 = vunpack.i.l.bf16 %v1110_v32  ;;  %v480_v25 = vsel %vm222_vm12, %v1101_v22, 0.0 }
 0x178   :  { %v878_v34 = vmul.f32 %v874_v40, %v870_v49  ;;  %v1122_v53 = vunpack.i.h.bf16 %v1120_v5  ;;  %v1121_v18 = vunpack.i.l.bf16 %v1120_v5  ;;  %v481_v9 = vsel %vm222_vm12, %v1102_v38, 0.0 }
 0x179   :  { %s1052_s3 = spop %1051  ;;  %649 = vadd.xlane.f32.xlu0 %v648_v57  ;;  %v482_v63 = vadd.f32 %v481_v9, %v480_v25  ;;  %v1117_v36 = vunpack.i.h.bf16 %v1115_v13  ;;  %v1116_v1 = vunpack.i.l.bf16 %v1115_v13  ;;  %v721_v59 = vsel %vm222_vm12, %v1111_v46, 0.0 }
 0x17a   :  { %184 = sst [smem:[#allocation2]] %s1052_s3  ;;  %v884_v52 = vsel %vm166_vm0, %v878_v34, 0.0  ;;  %v958_v12 = vsel %vm222_vm12, %v1121_v18, 0.0  ;;  %v959_v17 = vsel %vm222_vm12, %v1122_v53, 0.0  ;;  %v722_v29 = vsel %vm222_vm12, %v1112_v35, 0.0 }
 0x17b   :  { %v885_v4 = vadd.f32 %v884_v52, %v883_v60  ;;  %v960_v48 = vadd.f32 %v959_v17, %v958_v12  ;;  %v723_v6 = vadd.f32 %v722_v29, %v721_v59  ;;  %v936_v30 = vsel %vm222_vm12, %v1116_v1, 0.0 }
 0x17c   :  { %v937_v33 = vsel %vm222_vm12, %v1117_v36, 0.0  ;;  %v410_v51 = vrot.slane %v2290_v2, 4 }
 0x17d   :  { %886 = vadd.xlane.f32.xlu0 %v885_v4  ;;  %961 = vadd.xlane.f32.xlu1 %v960_v48  ;;  %v938_v61 = vadd.f32 %v937_v33, %v936_v30 }
 0x17e   :  { %v411_v54 = vadd.f32 %v410_v51, %v2290_v2 }
 0x180   :  { %v412_v3 = vrot.slane %v411_v54, 2 }
 0x181   :  { %248 = vadd.xlane.f32.xlu0 %v247_v27 }
 0x182   :  { %v413_v24 = vadd.f32 %v412_v3, %v411_v54 }
 0x184   :  { %v414_v60 = vrot.slane %v413_v24, 1 }
 0x185   :  { %483 = vadd.xlane.f32.xlu0 %v482_v63 }
 0x186   :  { %v415_v35 = vadd.f32 %v414_v60, %v413_v24 }
 0x189   :  { %724 = vadd.xlane.f32.xlu0 %v723_v6 }
 0x18d   :  { %939 = vadd.xlane.f32.xlu0 %v938_v61 }
 0x1d2   :  { %v227_v14 = vpop.xlane.xlu1 %226 }
 0x1d3   :  { %v228_v7 = vrot.slane %v227_v14, 4 }
 0x1d5   :  { %v229_v41 = vadd.f32 %v228_v7, %v227_v14 }
 0x1d6   :  { %v462_v45 = vpop.xlane.xlu1 %461 }
 0x1d7   :  { %v230_v47 = vrot.slane %v229_v41, 2  ;;  %v463_v39 = vrot.slane %v462_v45, 4 }
 0x1d9   :  { %v231_v0 = vadd.f32 %v230_v47, %v229_v41  ;;  %v464_v20 = vadd.f32 %v463_v39, %v462_v45 }
 0x1db   :  { %v232_v21 = vrot.slane %v231_v0, 1  ;;  %v465_v43 = vrot.slane %v464_v20, 2 }
 0x1dd   :  { %v233_v10 = vadd.f32 %v232_v21, %v231_v0  ;;  %v466_v5 = vadd.f32 %v465_v43, %v464_v20 }
 0x1df   :  { %1053 = vpush %v233_v10  ;;  %v467_v4 = vrot.slane %v466_v5, 1 }
 0x1e1   :  { %v468_v13 = vadd.f32 %v467_v4, %v466_v5 }
 0x1ef   :  { %v703_v37 = vpop.xlane.xlu1 %702 }
 0x1f0   :  { %v704_v32 = vrot.slane %v703_v37, 4 }
 0x1f2   :  { %v705_v50 = vadd.f32 %v704_v32, %v703_v37 }
 0x1f4   :  { %v706_v23 = vrot.slane %v705_v50, 2 }
 0x1f6   :  { %v707_v31 = vadd.f32 %v706_v23, %v705_v50 }
 0x1f8   :  { %v708_v6 = vrot.slane %v707_v31, 1 }
 0x1fa   :  { %v709_v0 = vadd.f32 %v708_v6, %v707_v31 }
 0x206   :  { %v650_v19 = vpop.xlane.xlu0 %649 }
 0x207   :  { %v651_v28 = vrot.slane %v650_v19, 4 }
 0x209   :  { %v652_v15 = vadd.f32 %v651_v28, %v650_v19 }
 0x20a   :  { %v887_v44 = vpop.xlane.xlu0 %886  ;;  %v962_v49 = vpop.xlane.xlu1 %961 }
 0x20b   :  { %v888_v42 = vrot.slane %v887_v44, 4  ;;  %v653_v26 = vrot.slane %v652_v15, 2  ;;  %v963_v40 = vrot.slane %v962_v49, 4 }
 0x20d   :  { %v889_v8 = vadd.f32 %v888_v42, %v887_v44  ;;  %v964_v12 = vadd.f32 %v963_v40, %v962_v49  ;;  %v654_v48 = vadd.f32 %v653_v26, %v652_v15 }
 0x20e   :  { %v249_v62 = vpop.xlane.xlu0 %248 }
 0x20f   :  { %v250_v11 = vrot.slane %v249_v62, 4  ;;  %v890_v52 = vrot.slane %v889_v8, 2  ;;  %v965_v25 = vrot.slane %v964_v12, 2  ;;  %v655_v63 = vrot.slane %v654_v48, 1 }
 0x210   :  { %s1054_s23 = spop %1053 }
 0x211   :  { %v251_v56 = vadd.f32 %v250_v11, %v249_v62  ;;  %236 = sst [smem:[#allocation4]] %s1054_s23  ;;  %v891_v36 = vadd.f32 %v890_v52, %v889_v8  ;;  %v966_v14 = vadd.f32 %v965_v25, %v964_v12  ;;  %v656_v7 = vadd.f32 %v655_v63, %v654_v48 }
 0x212   :  { %v484_v57 = vpop.xlane.xlu0 %483 }
 0x213   :  { %v252_v58 = vrot.slane %v251_v56, 2  ;;  %v485_v34 = vrot.slane %v484_v57, 4  ;;  %v892_v41 = vrot.slane %v891_v36, 1  ;;  %v967_v51 = vrot.slane %v966_v14, 1 }
 0x215   :  { %v486_v53 = vadd.f32 %v485_v34, %v484_v57  ;;  %v253_v18 = vadd.f32 %v252_v58, %v251_v56  ;;  %v893_v2 = vadd.f32 %v892_v41, %v891_v36  ;;  %v968_v37 = vadd.f32 %v967_v51, %v966_v14 }
 0x216   :  { %v725_v17 = vpop.xlane.xlu0 %724 }
 0x217   :  { %v487_v16 = vrot.slane %v486_v53, 2  ;;  %v726_v38 = vrot.slane %v725_v17, 4  ;;  %v254_v22 = vrot.slane %v253_v18, 1 }
 0x219   :  { %v727_v55 = vadd.f32 %v726_v38, %v725_v17  ;;  %v255_v27 = vadd.f32 %v254_v22, %v253_v18  ;;  %v488_v46 = vadd.f32 %v487_v16, %v486_v53 }
 0x21a   :  { %v940_v9 = vpop.xlane.xlu0 %939 }
 0x21b   :  { %v728_v1 = vrot.slane %v727_v55, 2  ;;  %v941_v59 = vrot.slane %v940_v9, 4  ;;  %1055 = vpush %v255_v27  ;;  %v489_v29 = vrot.slane %v488_v46, 1 }
 0x21c   :  { %1057 = vpush %v415_v35 }
 0x21d   :  { %v942_v30 = vadd.f32 %v941_v59, %v940_v9  ;;  %1059 = vpush %v468_v13  ;;  %v490_v33 = vadd.f32 %v489_v29, %v488_v46  ;;  %v729_v61 = vadd.f32 %v728_v1, %v727_v55 }
 0x21f   :  { %v943_v47 = vrot.slane %v942_v30, 2  ;;  %1061 = vpush %v490_v33  ;;  %v730_v21 = vrot.slane %v729_v61, 1 }
 0x220   :  { %1063 = vpush %v656_v7 }
 0x221   :  { %v944_v10 = vadd.f32 %v943_v47, %v942_v30  ;;  %1065 = vpush %v709_v0  ;;  %v731_v45 = vadd.f32 %v730_v21, %v729_v61 }
 0x223   :  { %1067 = vpush %v731_v45  ;;  %v945_v39 = vrot.slane %v944_v10, 1 }
 0x224   :  { %1069 = vpush %v893_v2 }
 0x225   :  { %v946_v19 = vadd.f32 %v945_v39, %v944_v10 }
 0x227   :  { %1071 = vpush %v946_v19 }
 0x228   :  { %1073 = vpush %v968_v37 }
 0x24c   :  { %s1056_s24 = spop %1055 }
 0x24d   :  { %259 = sst [smem:[#allocation4 + $0x1]] %s1056_s24  ;;  %s1058_s25 = spop %1057 }
 0x24e   :  { %421 = sst [smem:[#allocation2 + $0x80]] %s1058_s25  ;;  %s1060_s26 = spop %1059 }
 0x24f   :  { %471 = sst [smem:[#allocation4 + $0x80]] %s1060_s26 }
 0x250   :  { %s1062_s1 = spop %1061 }
 0x251   :  { %500 = sst [smem:[#allocation4 + $0x81]] %s1062_s1  ;;  %s1064_s30 = spop %1063 }
 0x252   :  { %662 = sst [smem:[#allocation2 + $0x100]] %s1064_s30  ;;  %s1066_s7 = spop %1065 }
 0x253   :  { %712 = sst [smem:[#allocation4 + $0x100]] %s1066_s7 }
 0x254   :  { %s1068_s10 = spop %1067 }
 0x255   :  { %737 = sst [smem:[#allocation4 + $0x101]] %s1068_s10  ;;  %s1070_s11 = spop %1069 }
 0x256   :  { %899 = sst [smem:[#allocation2 + $0x180]] %s1070_s11 }
 0x257   :  { %1238 = shalt.err (!%p1235_p4)
}
 0x258   :  { %s1259_s5 = smov [#allocation2]   ;;  %s1072_s13 = spop %1071 }
 0x259   :  { %984 = dma.smem_to_vmem %s1259_s5, 64, %s982_s29, [#allocation3]  }
 0x25a   :  { %949 = sst [smem:[#allocation4 + $0x180]] %s1072_s13  ;;  %s1074_s14 = spop %1073 }
 0x25b   :  { %974 = sst [smem:[#allocation4 + $0x181]] %s1074_s14  ;;  %s1239_s6 = scalar_lea.vmem %s992_s4, 64 }
 0x25c   :  { %p1240_p5 = scmp.ne.s32.totalorder %s992_s4, %s1239_s6  ;;  %p1244_p6 = scmp.lt.s32.totalorder %s992_s4, %s992_s4 }
 0x25d   :  { %p1245_p7 = scmp.lt.s32.totalorder %s1239_s6, %s1239_s6 }
 0x25f   :  { %p1246_p8 = por %p1245_p7, %p1244_p6 }
 0x261   :  { %p1247_p9 = pnand %p1246_p8, %p1240_p5 }
 0x263   :  { %1250 = shalt.err (!%p1247_p9)
}
 0x264   :  { %s1260_s15 = smov [#allocation4]  }
 0x265   :  { %994 = dma.smem_to_vmem %s1260_s15, 64, %s992_s4, [#allocation5]  }
 0x266   :  { %1251 = dma.done.wait [#allocation3], 64  }
 0x267   :  { %1252 = vsyncadd [#allocation3], 4294967232 }
 0x268   :  { %1253 = dma.done.wait [#allocation5], 64  }
 0x269   :  { %1254 = vsyncadd [#allocation5], 4294967232 }
 0x26a   :  { %1001 = sfence }
 0x26b   :  { %1002 = vsyncpa [#allocation3], 1 }
 0x26c   :  { %1003 = vsyncpa [#allocation5], 1 }

</bundles_post_ra>
